<compile_context>
chip_gen: v7x
topology: tpu7x:2x2x1
jax: 0.10.0
libtpu: 0.0.40
codegen_flags: <defaults>
</compile_context>

<pallas_src>
import jax
import jax.numpy as jnp
from jax.experimental import pallas as pl
from jax.experimental.pallas import tpu as pltpu

# v7x has 64 MiB physical VMEM (v5e/v6e: 128 MiB).  48 MiB keeps pipeline
# headroom on every generation while allowing large Bb / resident weights.
_VMEM_LIMIT = 48 * 1024 * 1024


# ----------------------------------------------------------------------------
# DeformablePatch sampling (anchor -> offset/scale -> linear interp gather).
# Stays in XLA: the data-dependent gather has no rectangular BlockSpec form.
# ----------------------------------------------------------------------------
def deformable_patch_sample(x, p):
    # x: (B, L, C)  ->  (B, new_len, C*patch_size) flattened sampled patches
    B, L, C = x.shape
    ps, st = p["patch_size"], p["patch_stride"]
    xt = jnp.transpose(x, (0, 2, 1))                               # (B, C, L)
    # replication pad on the right by one stride (new_len = L // stride)
    xp = jnp.concatenate([xt, jnp.repeat(xt[:, :, -1:], st, axis=2)], axis=2)
    Lp = L + st
    new_len = (Lp - ps) // st + 1

    starts = jnp.arange(new_len) * st
    base_idx = starts[:, None] + jnp.arange(ps)[None, :]           # (new_len, ps)
    anchor = xp[:, :, base_idx]                                    # (B, C, new_len, ps)
    anchor_flat = jnp.transpose(anchor, (0, 2, 1, 3)).reshape(B, new_len, C * ps)

    # Tiny (C*ps, 2) offset/scale predictor evaluated in XLA: a lane-padded
    # Pallas store for N=2 would inflate HBM store traffic ~64x.
    off = jnp.einsum("bnc,co->bno", anchor_flat, p["w_off"]) + p["b_off"]
    offset = jnp.tanh(off[..., 0]) * float(st)                     # (B, new_len)
    scale = 1.0 + 0.5 * jnp.tanh(off[..., 1])                      # (B, new_len)
    # TODO(synk): tanh-bounded offset/scale + linear interp approximates the
    # repo's exact box-coder / grid_sample parameterization.

    centers = starts.astype(jnp.float32) + (ps - 1) / 2.0
    rel = jnp.arange(ps, dtype=jnp.float32) - (ps - 1) / 2.0
    pos = (centers[None, :, None] + offset[:, :, None]
           + scale[:, :, None] * rel[None, None, :])
    pos = jnp.clip(pos, 0.0, float(Lp - 1))
    i0 = jnp.floor(pos).astype(jnp.int32)
    i1 = jnp.minimum(i0 + 1, Lp - 1)
    frac = pos - i0.astype(jnp.float32)

    # TODO(synk): data-dependent gather stays in XLA (no clean BlockSpec form).
    def gather(idx):
        idxb = jnp.broadcast_to(idx[:, None, :, :], (B, C, new_len, ps))
        idxb = idxb.reshape(B, C, new_len * ps)
        return jnp.take_along_axis(xp, idxb, axis=2).reshape(B, C, new_len, ps)

    g0, g1 = gather(i0), gather(i1)
    sampled = g0 * (1.0 - frac[:, None]) + g1 * frac[:, None]      # (B, C, new_len, ps)
    return jnp.transpose(sampled, (0, 2, 1, 3)).reshape(B, new_len, C * ps)


# ----------------------------------------------------------------------------
# Fully fused ConvTimeNet: patch projection + all blocks + head in ONE kernel.
# ----------------------------------------------------------------------------
def fused_convtimenet(sampled, params):
    # sampled: (B, L, C*ps) f32  ->  logits (B, num_class) f32
    depatch = params["depatch"]
    blocks = params["blocks"]
    head_w, head_b = params["head_w"], params["head_b"]

    B, L, CP = sampled.shape
    D = depatch["w_proj"].shape[1]
    d_ff = blocks[0]["w1"].shape[1]
    n_blocks = len(blocks)
    ks = [int(blk["k"]) for blk in blocks]
    k_max = max(ks)
    max_pad = (k_max - 1) // 2
    Lp = L + 2 * max_pad

    # Batch blocking: batch rows per grid step.  Keep >= 2 grid steps when
    # B >= 2 so both v7x TensorCores get work; larger Bb fills the MXU M dim.
    # TODO(synk): for B == 1 a halo'd time-tile axis would be needed on v7x.
    Bb = 1 if B < 2 else max(1, min(8, B // 2))
    G = -(-B // Bb)
    B_pad = G * Bb
    if B_pad != B:
        sampled = jnp.pad(sampled, ((0, B_pad - B), (0, 0), (0, 0)))
    Ncen = Bb * Lp - 2 * max_pad        # rows the per-block math operates on

    # ---------------- host-side weight packing / folding ----------------
    w_proj = depatch["w_proj"].astype(jnp.bfloat16)                 # (CP, D)
    b_proj = depatch["b_proj"].reshape(1, D).astype(jnp.float32)

    dw_w_all = jnp.zeros((n_blocks, k_max, D), jnp.float32)
    vecs, b1s, w1s, w2s, a1_list = [], [], [], [], []
    for i, blk in enumerate(blocks):
        k = ks[i]
        dw_w_all = dw_w_all.at[i, :k, :].set(blk["dw_w"].astype(jnp.float32))
        a1_list.append(float(blk["res_a1"]))
        a2 = float(blk["res_a2"])
        bn2_s = blk["bn2_s"].reshape(1, D)
        bn2_b = blk["bn2_b"].reshape(1, D)
        # fold a2 and the second FFN bias into the BN2 affine:
        #   (src + h@ (a2*w2) ) * bn2_s + (a2*b2*bn2_s + bn2_b)
        bn2_b_fold = (a2 * blk["b2"].reshape(1, D)) * bn2_s + bn2_b
        vecs.append(jnp.concatenate(
            [blk["dw_b"].reshape(1, D),
             blk["bn1_s"].reshape(1, D), blk["bn1_b"].reshape(1, D),
             bn2_s, bn2_b_fold], axis=0).astype(jnp.float32))        # (5, D)
        b1s.append(blk["b1"].reshape(1, d_ff).astype(jnp.float32))
        w1s.append(blk["w1"].astype(jnp.bfloat16))
        w2s.append((a2 * blk["w2"]).astype(jnp.bfloat16))
    vecs_all = jnp.stack(vecs)                                       # (n_blocks, 5, D)
    b1_all = jnp.stack(b1s)                                          # (n_blocks, 1, d_ff)
    w1_all = jnp.stack(w1s)                                          # (n_blocks, D, d_ff)
    w2_all = jnp.stack(w2s)                                          # (n_blocks, d_ff, D)

    C_out = head_w.shape[1]
    Cp = max(128, ((C_out + 127) // 128) * 128)                      # lane-dense output
    head_w_p = jnp.pad(head_w, ((0, 0), (0, Cp - C_out))).astype(jnp.bfloat16)
    head_b_p = jnp.pad(head_b.reshape(1, C_out),
                       ((0, 0), (0, Cp - C_out))).astype(jnp.float32)

    # ---------------- fused kernel ----------------
    def kernel(x_ref, wproj_ref, bproj_ref, dww_ref, vec_ref, b1_ref,
               w1_ref, w2_ref, hw_ref, hb_ref, o_ref, buf):
        # in-kernel zero padding + patch projection (bf16 MXU, f32 accum)
        buf[...] = jnp.zeros((Bb * Lp, D), jnp.float32)
        for r in range(Bb):
            pr = (jnp.dot(x_ref[r].astype(jnp.bfloat16), wproj_ref[...],
                          preferred_element_type=jnp.float32) + bproj_ref[...])
            buf[r * Lp + max_pad:r * Lp + max_pad + L, :] = pr

        out = None
        for bi in range(n_blocks):                 # static unroll over blocks
            k = ks[bi]
            pad = (k - 1) // 2
            start = max_pad - pad

            window = buf[...]                      # load padded window ONCE
            x_c = window[max_pad:max_pad + Ncen, :]
            dw = dww_ref[bi]                       # (k_max, D)
            vec = vec_ref[bi]                      # (5, D)

            # depthwise 'same' conv: value slices (sublane shifts), tap-0 init
            conv = window[start:start + Ncen, :] * dw[0:1, :]
            for t in range(1, k):
                conv = conv + window[start + t:start + t + Ncen, :] * dw[t:t + 1, :]
            conv = jax.nn.gelu(conv + vec[0:1, :])

            # SublayerConnection #1 (a1 is a compile-time constant) + BN1
            src = (x_c + a1_list[bi] * conv) * vec[1:2, :] + vec[2:3, :]

            # position-wise FFN, lane-dense (Ncen,D)@(D,d_ff), (Ncen,d_ff)@(d_ff,D)
            h = jax.nn.gelu(jnp.dot(src.astype(jnp.bfloat16), w1_ref[bi],
                                    preferred_element_type=jnp.float32)
                            + b1_ref[bi])
            f = jnp.dot(h.astype(jnp.bfloat16), w2_ref[bi],
                        preferred_element_type=jnp.float32)

            # SublayerConnection #2 + BN2 (a2 / b2 folded into w2 / vec[4])
            out = (src + f) * vec[3:4, :] + vec[4:5, :]

            if bi < n_blocks - 1:                  # pads stay zero for next block
                for r in range(Bb):
                    buf[r * Lp + max_pad:r * Lp + max_pad + L, :] = \
                        out[r * Lp:r * Lp + L, :]

        # fused head: AdaptiveMaxPool1d(1) over time + Linear, lane-padded out
        pooled_rows = [jnp.max(out[r * Lp:r * Lp + L, :], axis=0, keepdims=True)
                       for r in range(Bb)]
        pooled = pooled_rows[0] if Bb == 1 else jnp.concatenate(pooled_rows, axis=0)
        o_ref[0] = (jnp.dot(pooled.astype(jnp.bfloat16), hw_ref[...],
                            preferred_element_type=jnp.float32) + hb_ref[...])

    def const_spec(shape):
        return pl.BlockSpec(shape, lambda b, _n=len(shape): (0,) * _n)

    out = pl.pallas_call(
        kernel,
        out_shape=jax.ShapeDtypeStruct((G, Bb, Cp), jnp.float32),
        grid=(G,),
        in_specs=[
            pl.BlockSpec((Bb, L, CP), lambda b: (b, 0, 0)),   # sampled patches
            const_spec((CP, D)),                              # w_proj (bf16)
            const_spec((1, D)),                               # b_proj
            const_spec((n_blocks, k_max, D)),                 # depthwise weights
            const_spec((n_blocks, 5, D)),                     # folded bias/BN vectors
            const_spec((n_blocks, 1, d_ff)),                  # b1
            const_spec((n_blocks, D, d_ff)),                  # w1 (bf16)
            const_spec((n_blocks, d_ff, D)),                  # w2*a2 (bf16)
            const_spec((D, Cp)),                              # head weight (bf16)
            const_spec((1, Cp)),                              # head bias
        ],
        out_specs=pl.BlockSpec((1, Bb, Cp), lambda b: (b, 0, 0)),
        scratch_shapes=[pltpu.VMEM((Bb * Lp, D), jnp.float32)],
        compiler_params=pltpu.CompilerParams(
            dimension_semantics=("parallel",),
            vmem_limit_bytes=_VMEM_LIMIT,
        ),
    )(sampled, w_proj, b_proj, dw_w_all, vecs_all, b1_all,
      w1_all, w2_all, head_w_p, head_b_p)

    return out.reshape(B_pad, Cp)[:B, :C_out]


# ----------------------------------------------------------------------------
# Full model forward (Model.forward)
# ----------------------------------------------------------------------------
def model_forward(x_enc, x_mark_enc, x_dec, x_mark_dec, params, mask=None):
    del x_mark_enc, x_dec, x_mark_dec, mask          # unused (as in torch forward)
    sampled = deformable_patch_sample(x_enc, params["depatch"])   # (B, new_len, C*ps)
    return fused_convtimenet(sampled, params)                     # (B, num_class)


# ----------------------------------------------------------------------------
# Parameter construction (deterministic, synthetic)
# ----------------------------------------------------------------------------
def _bn_fold(gamma, beta, rmean, rvar, eps=1e-5):
    scale = gamma / jnp.sqrt(rvar + eps)
    shift = beta - rmean * scale
    return scale, shift


def build_params(key, *, enc_in, seq_len, d_model, d_ff, num_class,
                 patch_size, patch_stride, dw_ks):
    del seq_len
    keys = iter(jax.random.split(key, 16 + 20 * len(dw_ks)))

    def nrm(shape, scale=0.1):
        return scale * jax.random.normal(next(keys), shape, jnp.float32)

    cp = enc_in * patch_size
    depatch = dict(
        patch_size=patch_size,
        patch_stride=patch_stride,
        w_off=nrm((cp, 2)),
        b_off=nrm((2,), 0.01),
        w_proj=nrm((cp, d_model)),
        b_proj=nrm((d_model,), 0.01),
    )

    blocks = []
    for k in dw_ks:
        # depthwise weights stored (tap, channel); re_param merge (eval mode)
        w_large = nrm((k, d_model))
        w_small = nrm((3, d_model))
        b_large = nrm((d_model,), 0.01)
        b_small = nrm((d_model,), 0.01)
        off = (k - 3) // 2
        dw_w = w_large.at[off:off + 3, :].add(w_small)
        dw_b = b_large + b_small

        bn1_s, bn1_b = _bn_fold(1.0 + nrm((d_model,), 0.05), nrm((d_model,), 0.05),
                                nrm((d_model,), 0.05),
                                1.0 + jnp.abs(nrm((d_model,), 0.05)))
        bn2_s, bn2_b = _bn_fold(1.0 + nrm((d_model,), 0.05), nrm((d_model,), 0.05),
                                nrm((d_model,), 0.05),
                                1.0 + jnp.abs(nrm((d_model,), 0.05)))
        blocks.append(dict(
            k=k, dw_w=dw_w, dw_b=dw_b,
            bn1_s=bn1_s, bn1_b=bn1_b,
            w1=nrm((d_model, d_ff)), b1=nrm((d_ff,), 0.01),
            w2=nrm((d_ff, d_model)), b2=nrm((d_model,), 0.01),
            bn2_s=bn2_s, bn2_b=bn2_b,
            # torch inits SublayerConnection.a to 1e-8; nontrivial values here
            res_a1=0.5, res_a2=0.5,
        ))

    head_w = nrm((d_model, num_class))
    head_b = nrm((num_class,), 0.01)
    return dict(depatch=depatch, blocks=blocks, head_w=head_w, head_b=head_b)


if __name__ == "__main__":
    # small config consistent with the module
    B, seq_len, enc_in = 2, 16, 4
    d_model, d_ff, num_class = 32, 64, 3
    patch_size = 8
    patch_stride = int(patch_size * 0.5)
    dw_ks = [3, 5, 7]

    key = jax.random.PRNGKey(0)
    kp, kx = jax.random.split(key)
    params = build_params(
        kp, enc_in=enc_in, seq_len=seq_len, d_model=d_model, d_ff=d_ff,
        num_class=num_class, patch_size=patch_size, patch_stride=patch_stride,
        dw_ks=dw_ks,
    )

    x_enc = jax.random.normal(kx, (B, seq_len, enc_in), jnp.float32)
    x_mark_enc = jnp.zeros((B, seq_len, 4), jnp.float32)
    x_dec = jnp.zeros((B, seq_len, enc_in), jnp.float32)
    x_mark_dec = jnp.zeros((B, seq_len, 4), jnp.float32)

    out = model_forward(x_enc, x_mark_enc, x_dec, x_mark_dec, params)
    out = jax.block_until_ready(out)
    assert out.shape == (B, num_class), out.shape
    assert bool(jnp.all(jnp.isfinite(out)))
    print("KERNEL_OK")
</pallas_src>

<mosaic_0001>
module attributes {stable_mosaic.version = 11 : i64} {
  func.func @kernel(%arg0: i32, %arg1: memref<1x4x32xf32, #tpu.memory_space<vmem>>, %arg2: memref<32x32xbf16, #tpu.memory_space<vmem>>, %arg3: memref<1x32xf32, #tpu.memory_space<vmem>>, %arg4: memref<3x7x32xf32, #tpu.memory_space<vmem>>, %arg5: memref<3x5x32xf32, #tpu.memory_space<vmem>>, %arg6: memref<3x1x64xf32, #tpu.memory_space<vmem>>, %arg7: memref<3x32x64xbf16, #tpu.memory_space<vmem>>, %arg8: memref<3x64x32xbf16, #tpu.memory_space<vmem>>, %arg9: memref<32x128xbf16, #tpu.memory_space<vmem>>, %arg10: memref<1x128xf32, #tpu.memory_space<vmem>>, %arg11: memref<1x1x128xf32, #tpu.memory_space<vmem>>, %arg12: memref<10x32xf32, #tpu.memory_space<vmem>>) attributes {dimension_semantics = [#tpu.dimension_semantics<parallel>], iteration_bounds = array<i64: 2>, scalar_prefetch = 0 : i64, scratch_operands = 1 : i64, tpu.core_type = #tpu.core_type<tc>, window_params = [{transform_indices = @transform_0, window_bounds = array<i64: 1, 4, 32>}, {pipeline_mode = #tpu.pipeline_mode<synchronous>, transform_indices = @transform_1, window_bounds = array<i64: 32, 32>}, {pipeline_mode = #tpu.pipeline_mode<synchronous>, transform_indices = @transform_2, window_bounds = array<i64: 1, 32>}, {pipeline_mode = #tpu.pipeline_mode<synchronous>, transform_indices = @transform_3, window_bounds = array<i64: 3, 7, 32>}, {pipeline_mode = #tpu.pipeline_mode<synchronous>, transform_indices = @transform_4, window_bounds = array<i64: 3, 5, 32>}, {pipeline_mode = #tpu.pipeline_mode<synchronous>, transform_indices = @transform_5, window_bounds = array<i64: 3, 1, 64>}, {pipeline_mode = #tpu.pipeline_mode<synchronous>, transform_indices = @transform_6, window_bounds = array<i64: 3, 32, 64>}, {pipeline_mode = #tpu.pipeline_mode<synchronous>, transform_indices = @transform_7, window_bounds = array<i64: 3, 64, 32>}, {pipeline_mode = #tpu.pipeline_mode<synchronous>, transform_indices = @transform_8, window_bounds = array<i64: 32, 128>}, {pipeline_mode = #tpu.pipeline_mode<synchronous>, transform_indices = @transform_9, window_bounds = array<i64: 1, 128>}, {transform_indices = @transform_10, window_bounds = array<i64: 1, 1, 128>}]} {
    %cst = arith.constant 0.000000e+00 : f32
    %0 = vector.broadcast %cst : f32 to vector<10x32xf32>
    %c0 = arith.constant 0 : index
    %c0_0 = arith.constant 0 : index
    %1 = vector.load %arg12[%c0, %c0_0] : memref<10x32xf32, #tpu.memory_space<vmem>>, vector<10x32xf32>
    tpu.vector_store %arg12[%c0, %c0_0], %0 {strides = array<i32>} : memref<10x32xf32, #tpu.memory_space<vmem>>, vector<10x32xf32>,
    %c0_1 = arith.constant 0 : index
    %c0_2 = arith.constant 0 : index
    %c0_3 = arith.constant 0 : index
    %2 = vector.load %arg1[%c0_1, %c0_2, %c0_3] : memref<1x4x32xf32, #tpu.memory_space<vmem>>, vector<1x4x32xf32>
    %3 = vector.shape_cast %2 : vector<1x4x32xf32> to vector<4x32xf32>
    %4 = arith.truncf %3 : vector<4x32xf32> to vector<4x32xbf16>
    %c0_4 = arith.constant 0 : index
    %c0_5 = arith.constant 0 : index
    %5 = vector.load %arg2[%c0_4, %c0_5] : memref<32x32xbf16, #tpu.memory_space<vmem>>, vector<32x32xbf16>
    %cst_6 = arith.constant dense<0.000000e+00> : vector<4x32xf32>
    %6 = tpu.matmul %4, %5, %cst_6 {dimension_numbers = #tpu.dot_dimension_numbers<[1], [0], [0], [1], [0, 0, 1, 1], [], []>} : vector<4x32xbf16>, vector<32x32xbf16>, vector<4x32xf32> -> vector<4x32xf32>
    %c0_7 = arith.constant 0 : index
    %c0_8 = arith.constant 0 : index
    %7 = vector.load %arg3[%c0_7, %c0_8] : memref<1x32xf32, #tpu.memory_space<vmem>>, vector<1x32xf32>
    %8 = vector.broadcast %7 : vector<1x32xf32> to vector<4x32xf32>
    %9 = arith.addf %6, %8 : vector<4x32xf32>
    %c3 = arith.constant 3 : index
    %c0_9 = arith.constant 0 : index
    %10 = vector.load %arg12[%c3, %c0_9] : memref<10x32xf32, #tpu.memory_space<vmem>>, vector<4x32xf32>
    tpu.vector_store %arg12[%c3, %c0_9], %9 {strides = array<i32>} : memref<10x32xf32, #tpu.memory_space<vmem>>, vector<4x32xf32>,
    %c0_10 = arith.constant 0 : index
    %c0_11 = arith.constant 0 : index
    %11 = vector.load %arg12[%c0_10, %c0_11] : memref<10x32xf32, #tpu.memory_space<vmem>>, vector<10x32xf32>
    %12 = vector.extract_strided_slice %11 {offsets = [3, 0], sizes = [4, 32], strides = [1, 1]} : vector<10x32xf32> to vector<4x32xf32>
    %c0_12 = arith.constant 0 : index
    %c0_13 = arith.constant 0 : index
    %c0_14 = arith.constant 0 : index
    %13 = vector.load %arg4[%c0_12, %c0_13, %c0_14] : memref<3x7x32xf32, #tpu.memory_space<vmem>>, vector<1x7x32xf32>
    %14 = vector.shape_cast %13 : vector<1x7x32xf32> to vector<7x32xf32>
    %c0_15 = arith.constant 0 : index
    %c0_16 = arith.constant 0 : index
    %c0_17 = arith.constant 0 : index
    %15 = vector.load %arg5[%c0_15, %c0_16, %c0_17] : memref<3x5x32xf32, #tpu.memory_space<vmem>>, vector<1x5x32xf32>
    %16 = vector.shape_cast %15 : vector<1x5x32xf32> to vector<5x32xf32>
    %17 = vector.extract_strided_slice %11 {offsets = [2, 0], sizes = [4, 32], strides = [1, 1]} : vector<10x32xf32> to vector<4x32xf32>
    %18 = vector.extract_strided_slice %14 {offsets = [0, 0], sizes = [1, 32], strides = [1, 1]} : vector<7x32xf32> to vector<1x32xf32>
    %19 = vector.broadcast %18 : vector<1x32xf32> to vector<4x32xf32>
    %20 = arith.mulf %17, %19 : vector<4x32xf32>
    %21 = vector.extract_strided_slice %11 {offsets = [3, 0], sizes = [4, 32], strides = [1, 1]} : vector<10x32xf32> to vector<4x32xf32>
    %22 = vector.extract_strided_slice %14 {offsets = [1, 0], sizes = [1, 32], strides = [1, 1]} : vector<7x32xf32> to vector<1x32xf32>
    %23 = vector.broadcast %22 : vector<1x32xf32> to vector<4x32xf32>
    %24 = arith.mulf %21, %23 : vector<4x32xf32>
    %25 = arith.addf %20, %24 : vector<4x32xf32>
    %26 = vector.extract_strided_slice %11 {offsets = [4, 0], sizes = [4, 32], strides = [1, 1]} : vector<10x32xf32> to vector<4x32xf32>
    %27 = vector.extract_strided_slice %14 {offsets = [2, 0], sizes = [1, 32], strides = [1, 1]} : vector<7x32xf32> to vector<1x32xf32>
    %28 = vector.broadcast %27 : vector<1x32xf32> to vector<4x32xf32>
    %29 = arith.mulf %26, %28 : vector<4x32xf32>
    %30 = arith.addf %25, %29 : vector<4x32xf32>
    %31 = vector.extract_strided_slice %16 {offsets = [0, 0], sizes = [1, 32], strides = [1, 1]} : vector<5x32xf32> to vector<1x32xf32>
    %32 = vector.broadcast %31 : vector<1x32xf32> to vector<4x32xf32>
    %33 = arith.addf %30, %32 : vector<4x32xf32>
    %34 = arith.mulf %33, %33 : vector<4x32xf32>
    %35 = arith.mulf %33, %34 : vector<4x32xf32>
    %cst_18 = arith.constant 4.471500e-02 : f32
    %36 = vector.broadcast %cst_18 : f32 to vector<4x32xf32>
    %37 = arith.mulf %36, %35 : vector<4x32xf32>
    %38 = arith.addf %33, %37 : vector<4x32xf32>
    %cst_19 = arith.constant 0.797884583 : f32
    %39 = vector.broadcast %cst_19 : f32 to vector<4x32xf32>
    %40 = arith.mulf %39, %38 : vector<4x32xf32>
    %41 = math.tanh %40 : vector<4x32xf32>
    %cst_20 = arith.constant 1.000000e+00 : f32
    %42 = vector.broadcast %cst_20 : f32 to vector<4x32xf32>
    %43 = arith.addf %42, %41 : vector<4x32xf32>
    %cst_21 = arith.constant 5.000000e-01 : f32
    %44 = vector.broadcast %cst_21 : f32 to vector<4x32xf32>
    %45 = arith.mulf %44, %43 : vector<4x32xf32>
    %46 = arith.mulf %33, %45 : vector<4x32xf32>
    %cst_22 = arith.constant 5.000000e-01 : f32
    %47 = vector.broadcast %cst_22 : f32 to vector<4x32xf32>
    %48 = arith.mulf %47, %46 : vector<4x32xf32>
    %49 = arith.addf %12, %48 : vector<4x32xf32>
    %50 = vector.extract_strided_slice %16 {offsets = [1, 0], sizes = [1, 32], strides = [1, 1]} : vector<5x32xf32> to vector<1x32xf32>
    %51 = vector.broadcast %50 : vector<1x32xf32> to vector<4x32xf32>
    %52 = arith.mulf %49, %51 : vector<4x32xf32>
    %53 = vector.extract_strided_slice %16 {offsets = [2, 0], sizes = [1, 32], strides = [1, 1]} : vector<5x32xf32> to vector<1x32xf32>
    %54 = vector.broadcast %53 : vector<1x32xf32> to vector<4x32xf32>
    %55 = arith.addf %52, %54 : vector<4x32xf32>
    %56 = arith.truncf %55 : vector<4x32xf32> to vector<4x32xbf16>
    %c0_23 = arith.constant 0 : index
    %c0_24 = arith.constant 0 : index
    %c0_25 = arith.constant 0 : index
    %57 = vector.load %arg7[%c0_23, %c0_24, %c0_25] : memref<3x32x64xbf16, #tpu.memory_space<vmem>>, vector<1x32x64xbf16>
    %58 = vector.shape_cast %57 : vector<1x32x64xbf16> to vector<32x64xbf16>
    %cst_26 = arith.constant dense<0.000000e+00> : vector<4x64xf32>
    %59 = tpu.matmul %56, %58, %cst_26 {dimension_numbers = #tpu.dot_dimension_numbers<[1], [0], [0], [1], [0, 0, 1, 1], [], []>} : vector<4x32xbf16>, vector<32x64xbf16>, vector<4x64xf32> -> vector<4x64xf32>
    %c0_27 = arith.constant 0 : index
    %c0_28 = arith.constant 0 : index
    %c0_29 = arith.constant 0 : index
    %60 = vector.load %arg6[%c0_27, %c0_28, %c0_29] : memref<3x1x64xf32, #tpu.memory_space<vmem>>, vector<1x1x64xf32>
    %61 = vector.shape_cast %60 : vector<1x1x64xf32> to vector<1x64xf32>
    %62 = vector.broadcast %61 : vector<1x64xf32> to vector<4x64xf32>
    %63 = arith.addf %59, %62 : vector<4x64xf32>
    %64 = arith.mulf %63, %63 : vector<4x64xf32>
    %65 = arith.mulf %63, %64 : vector<4x64xf32>
    %cst_30 = arith.constant 4.471500e-02 : f32
    %66 = vector.broadcast %cst_30 : f32 to vector<4x64xf32>
    %67 = arith.mulf %66, %65 : vector<4x64xf32>
    %68 = arith.addf %63, %67 : vector<4x64xf32>
    %cst_31 = arith.constant 0.797884583 : f32
    %69 = vector.broadcast %cst_31 : f32 to vector<4x64xf32>
    %70 = arith.mulf %69, %68 : vector<4x64xf32>
    %71 = math.tanh %70 : vector<4x64xf32>
    %cst_32 = arith.constant 1.000000e+00 : f32
    %72 = vector.broadcast %cst_32 : f32 to vector<4x64xf32>
    %73 = arith.addf %72, %71 : vector<4x64xf32>
    %cst_33 = arith.constant 5.000000e-01 : f32
    %74 = vector.broadcast %cst_33 : f32 to vector<4x64xf32>
    %75 = arith.mulf %74, %73 : vector<4x64xf32>
    %76 = arith.mulf %63, %75 : vector<4x64xf32>
    %77 = arith.truncf %76 : vector<4x64xf32> to vector<4x64xbf16>
    %c0_34 = arith.constant 0 : index
    %c0_35 = arith.constant 0 : index
    %c0_36 = arith.constant 0 : index
    %78 = vector.load %arg8[%c0_34, %c0_35, %c0_36] : memref<3x64x32xbf16, #tpu.memory_space<vmem>>, vector<1x64x32xbf16>
    %79 = vector.shape_cast %78 : vector<1x64x32xbf16> to vector<64x32xbf16>
    %cst_37 = arith.constant dense<0.000000e+00> : vector<4x32xf32>
    %80 = tpu.matmul %77, %79, %cst_37 {dimension_numbers = #tpu.dot_dimension_numbers<[1], [0], [0], [1], [0, 0, 1, 1], [], []>} : vector<4x64xbf16>, vector<64x32xbf16>, vector<4x32xf32> -> vector<4x32xf32>
    %81 = arith.addf %55, %80 : vector<4x32xf32>
    %82 = vector.extract_strided_slice %16 {offsets = [3, 0], sizes = [1, 32], strides = [1, 1]} : vector<5x32xf32> to vector<1x32xf32>
    %83 = vector.broadcast %82 : vector<1x32xf32> to vector<4x32xf32>
    %84 = arith.mulf %81, %83 : vector<4x32xf32>
    %85 = vector.extract_strided_slice %16 {offsets = [4, 0], sizes = [1, 32], strides = [1, 1]} : vector<5x32xf32> to vector<1x32xf32>
    %86 = vector.broadcast %85 : vector<1x32xf32> to vector<4x32xf32>
    %87 = arith.addf %84, %86 : vector<4x32xf32>
    %c3_38 = arith.constant 3 : index
    %c0_39 = arith.constant 0 : index
    %88 = vector.load %arg12[%c3_38, %c0_39] : memref<10x32xf32, #tpu.memory_space<vmem>>, vector<4x32xf32>
    tpu.vector_store %arg12[%c3_38, %c0_39], %87 {strides = array<i32>} : memref<10x32xf32, #tpu.memory_space<vmem>>, vector<4x32xf32>,
    %c0_40 = arith.constant 0 : index
    %c0_41 = arith.constant 0 : index
    %89 = vector.load %arg12[%c0_40, %c0_41] : memref<10x32xf32, #tpu.memory_space<vmem>>, vector<10x32xf32>
    %90 = vector.extract_strided_slice %89 {offsets = [3, 0], sizes = [4, 32], strides = [1, 1]} : vector<10x32xf32> to vector<4x32xf32>
    %c1 = arith.constant 1 : index
    %c0_42 = arith.constant 0 : index
    %c0_43 = arith.constant 0 : index
    %91 = vector.load %arg4[%c1, %c0_42, %c0_43] : memref<3x7x32xf32, #tpu.memory_space<vmem>>, vector<1x7x32xf32>
    %92 = vector.shape_cast %91 : vector<1x7x32xf32> to vector<7x32xf32>
    %c1_44 = arith.constant 1 : index
    %c0_45 = arith.constant 0 : index
    %c0_46 = arith.constant 0 : index
    %93 = vector.load %arg5[%c1_44, %c0_45, %c0_46] : memref<3x5x32xf32, #tpu.memory_space<vmem>>, vector<1x5x32xf32>
    %94 = vector.shape_cast %93 : vector<1x5x32xf32> to vector<5x32xf32>
    %95 = vector.extract_strided_slice %89 {offsets = [1, 0], sizes = [4, 32], strides = [1, 1]} : vector<10x32xf32> to vector<4x32xf32>
    %96 = vector.extract_strided_slice %92 {offsets = [0, 0], sizes = [1, 32], strides = [1, 1]} : vector<7x32xf32> to vector<1x32xf32>
    %97 = vector.broadcast %96 : vector<1x32xf32> to vector<4x32xf32>
    %98 = arith.mulf %95, %97 : vector<4x32xf32>
    %99 = vector.extract_strided_slice %89 {offsets = [2, 0], sizes = [4, 32], strides = [1, 1]} : vector<10x32xf32> to vector<4x32xf32>
    %100 = vector.extract_strided_slice %92 {offsets = [1, 0], sizes = [1, 32], strides = [1, 1]} : vector<7x32xf32> to vector<1x32xf32>
    %101 = vector.broadcast %100 : vector<1x32xf32> to vector<4x32xf32>
    %102 = arith.mulf %99, %101 : vector<4x32xf32>
    %103 = arith.addf %98, %102 : vector<4x32xf32>
    %104 = vector.extract_strided_slice %89 {offsets = [3, 0], sizes = [4, 32], strides = [1, 1]} : vector<10x32xf32> to vector<4x32xf32>
    %105 = vector.extract_strided_slice %92 {offsets = [2, 0], sizes = [1, 32], strides = [1, 1]} : vector<7x32xf32> to vector<1x32xf32>
    %106 = vector.broadcast %105 : vector<1x32xf32> to vector<4x32xf32>
    %107 = arith.mulf %104, %106 : vector<4x32xf32>
    %108 = arith.addf %103, %107 : vector<4x32xf32>
    %109 = vector.extract_strided_slice %89 {offsets = [4, 0], sizes = [4, 32], strides = [1, 1]} : vector<10x32xf32> to vector<4x32xf32>
    %110 = vector.extract_strided_slice %92 {offsets = [3, 0], sizes = [1, 32], strides = [1, 1]} : vector<7x32xf32> to vector<1x32xf32>
    %111 = vector.broadcast %110 : vector<1x32xf32> to vector<4x32xf32>
    %112 = arith.mulf %109, %111 : vector<4x32xf32>
    %113 = arith.addf %108, %112 : vector<4x32xf32>
    %114 = vector.extract_strided_slice %89 {offsets = [5, 0], sizes = [4, 32], strides = [1, 1]} : vector<10x32xf32> to vector<4x32xf32>
    %115 = vector.extract_strided_slice %92 {offsets = [4, 0], sizes = [1, 32], strides = [1, 1]} : vector<7x32xf32> to vector<1x32xf32>
    %116 = vector.broadcast %115 : vector<1x32xf32> to vector<4x32xf32>
    %117 = arith.mulf %114, %116 : vector<4x32xf32>
    %118 = arith.addf %113, %117 : vector<4x32xf32>
    %119 = vector.extract_strided_slice %94 {offsets = [0, 0], sizes = [1, 32], strides = [1, 1]} : vector<5x32xf32> to vector<1x32xf32>
    %120 = vector.broadcast %119 : vector<1x32xf32> to vector<4x32xf32>
    %121 = arith.addf %118, %120 : vector<4x32xf32>
    %122 = arith.mulf %121, %121 : vector<4x32xf32>
    %123 = arith.mulf %121, %122 : vector<4x32xf32>
    %cst_47 = arith.constant 4.471500e-02 : f32
    %124 = vector.broadcast %cst_47 : f32 to vector<4x32xf32>
    %125 = arith.mulf %124, %123 : vector<4x32xf32>
    %126 = arith.addf %121, %125 : vector<4x32xf32>
    %cst_48 = arith.constant 0.797884583 : f32
    %127 = vector.broadcast %cst_48 : f32 to vector<4x32xf32>
    %128 = arith.mulf %127, %126 : vector<4x32xf32>
    %129 = math.tanh %128 : vector<4x32xf32>
    %cst_49 = arith.constant 1.000000e+00 : f32
    %130 = vector.broadcast %cst_49 : f32 to vector<4x32xf32>
    %131 = arith.addf %130, %129 : vector<4x32xf32>
    %cst_50 = arith.constant 5.000000e-01 : f32
    %132 = vector.broadcast %cst_50 : f32 to vector<4x32xf32>
    %133 = arith.mulf %132, %131 : vector<4x32xf32>
    %134 = arith.mulf %121, %133 : vector<4x32xf32>
    %cst_51 = arith.constant 5.000000e-01 : f32
    %135 = vector.broadcast %cst_51 : f32 to vector<4x32xf32>
    %136 = arith.mulf %135, %134 : vector<4x32xf32>
    %137 = arith.addf %90, %136 : vector<4x32xf32>
    %138 = vector.extract_strided_slice %94 {offsets = [1, 0], sizes = [1, 32], strides = [1, 1]} : vector<5x32xf32> to vector<1x32xf32>
    %139 = vector.broadcast %138 : vector<1x32xf32> to vector<4x32xf32>
    %140 = arith.mulf %137, %139 : vector<4x32xf32>
    %141 = vector.extract_strided_slice %94 {offsets = [2, 0], sizes = [1, 32], strides = [1, 1]} : vector<5x32xf32> to vector<1x32xf32>
    %142 = vector.broadcast %141 : vector<1x32xf32> to vector<4x32xf32>
    %143 = arith.addf %140, %142 : vector<4x32xf32>
    %144 = arith.truncf %143 : vector<4x32xf32> to vector<4x32xbf16>
    %c1_52 = arith.constant 1 : index
    %c0_53 = arith.constant 0 : index
    %c0_54 = arith.constant 0 : index
    %145 = vector.load %arg7[%c1_52, %c0_53, %c0_54] : memref<3x32x64xbf16, #tpu.memory_space<vmem>>, vector<1x32x64xbf16>
    %146 = vector.shape_cast %145 : vector<1x32x64xbf16> to vector<32x64xbf16>
    %cst_55 = arith.constant dense<0.000000e+00> : vector<4x64xf32>
    %147 = tpu.matmul %144, %146, %cst_55 {dimension_numbers = #tpu.dot_dimension_numbers<[1], [0], [0], [1], [0, 0, 1, 1], [], []>} : vector<4x32xbf16>, vector<32x64xbf16>, vector<4x64xf32> -> vector<4x64xf32>
    %c1_56 = arith.constant 1 : index
    %c0_57 = arith.constant 0 : index
    %c0_58 = arith.constant 0 : index
    %148 = vector.load %arg6[%c1_56, %c0_57, %c0_58] : memref<3x1x64xf32, #tpu.memory_space<vmem>>, vector<1x1x64xf32>
    %149 = vector.shape_cast %148 : vector<1x1x64xf32> to vector<1x64xf32>
    %150 = vector.broadcast %149 : vector<1x64xf32> to vector<4x64xf32>
    %151 = arith.addf %147, %150 : vector<4x64xf32>
    %152 = arith.mulf %151, %151 : vector<4x64xf32>
    %153 = arith.mulf %151, %152 : vector<4x64xf32>
    %cst_59 = arith.constant 4.471500e-02 : f32
    %154 = vector.broadcast %cst_59 : f32 to vector<4x64xf32>
    %155 = arith.mulf %154, %153 : vector<4x64xf32>
    %156 = arith.addf %151, %155 : vector<4x64xf32>
    %cst_60 = arith.constant 0.797884583 : f32
    %157 = vector.broadcast %cst_60 : f32 to vector<4x64xf32>
    %158 = arith.mulf %157, %156 : vector<4x64xf32>
    %159 = math.tanh %158 : vector<4x64xf32>
    %cst_61 = arith.constant 1.000000e+00 : f32
    %160 = vector.broadcast %cst_61 : f32 to vector<4x64xf32>
    %161 = arith.addf %160, %159 : vector<4x64xf32>
    %cst_62 = arith.constant 5.000000e-01 : f32
    %162 = vector.broadcast %cst_62 : f32 to vector<4x64xf32>
    %163 = arith.mulf %162, %161 : vector<4x64xf32>
    %164 = arith.mulf %151, %163 : vector<4x64xf32>
    %165 = arith.truncf %164 : vector<4x64xf32> to vector<4x64xbf16>
    %c1_63 = arith.constant 1 : index
    %c0_64 = arith.constant 0 : index
    %c0_65 = arith.constant 0 : index
    %166 = vector.load %arg8[%c1_63, %c0_64, %c0_65] : memref<3x64x32xbf16, #tpu.memory_space<vmem>>, vector<1x64x32xbf16>
    %167 = vector.shape_cast %166 : vector<1x64x32xbf16> to vector<64x32xbf16>
    %cst_66 = arith.constant dense<0.000000e+00> : vector<4x32xf32>
    %168 = tpu.matmul %165, %167, %cst_66 {dimension_numbers = #tpu.dot_dimension_numbers<[1], [0], [0], [1], [0, 0, 1, 1], [], []>} : vector<4x64xbf16>, vector<64x32xbf16>, vector<4x32xf32> -> vector<4x32xf32>
    %169 = arith.addf %143, %168 : vector<4x32xf32>
    %170 = vector.extract_strided_slice %94 {offsets = [3, 0], sizes = [1, 32], strides = [1, 1]} : vector<5x32xf32> to vector<1x32xf32>
    %171 = vector.broadcast %170 : vector<1x32xf32> to vector<4x32xf32>
    %172 = arith.mulf %169, %171 : vector<4x32xf32>
    %173 = vector.extract_strided_slice %94 {offsets = [4, 0], sizes = [1, 32], strides = [1, 1]} : vector<5x32xf32> to vector<1x32xf32>
    %174 = vector.broadcast %173 : vector<1x32xf32> to vector<4x32xf32>
    %175 = arith.addf %172, %174 : vector<4x32xf32>
    %c3_67 = arith.constant 3 : index
    %c0_68 = arith.constant 0 : index
    %176 = vector.load %arg12[%c3_67, %c0_68] : memref<10x32xf32, #tpu.memory_space<vmem>>, vector<4x32xf32>
    tpu.vector_store %arg12[%c3_67, %c0_68], %175 {strides = array<i32>} : memref<10x32xf32, #tpu.memory_space<vmem>>, vector<4x32xf32>,
    %c0_69 = arith.constant 0 : index
    %c0_70 = arith.constant 0 : index
    %177 = vector.load %arg12[%c0_69, %c0_70] : memref<10x32xf32, #tpu.memory_space<vmem>>, vector<10x32xf32>
    %178 = vector.extract_strided_slice %177 {offsets = [3, 0], sizes = [4, 32], strides = [1, 1]} : vector<10x32xf32> to vector<4x32xf32>
    %c2 = arith.constant 2 : index
    %c0_71 = arith.constant 0 : index
    %c0_72 = arith.constant 0 : index
    %179 = vector.load %arg4[%c2, %c0_71, %c0_72] : memref<3x7x32xf32, #tpu.memory_space<vmem>>, vector<1x7x32xf32>
    %180 = vector.shape_cast %179 : vector<1x7x32xf32> to vector<7x32xf32>
    %c2_73 = arith.constant 2 : index
    %c0_74 = arith.constant 0 : index
    %c0_75 = arith.constant 0 : index
    %181 = vector.load %arg5[%c2_73, %c0_74, %c0_75] : memref<3x5x32xf32, #tpu.memory_space<vmem>>, vector<1x5x32xf32>
    %182 = vector.shape_cast %181 : vector<1x5x32xf32> to vector<5x32xf32>
    %183 = vector.extract_strided_slice %177 {offsets = [0, 0], sizes = [4, 32], strides = [1, 1]} : vector<10x32xf32> to vector<4x32xf32>
    %184 = vector.extract_strided_slice %180 {offsets = [0, 0], sizes = [1, 32], strides = [1, 1]} : vector<7x32xf32> to vector<1x32xf32>
    %185 = vector.broadcast %184 : vector<1x32xf32> to vector<4x32xf32>
    %186 = arith.mulf %183, %185 : vector<4x32xf32>
    %187 = vector.extract_strided_slice %177 {offsets = [1, 0], sizes = [4, 32], strides = [1, 1]} : vector<10x32xf32> to vector<4x32xf32>
    %188 = vector.extract_strided_slice %180 {offsets = [1, 0], sizes = [1, 32], strides = [1, 1]} : vector<7x32xf32> to vector<1x32xf32>
    %189 = vector.broadcast %188 : vector<1x32xf32> to vector<4x32xf32>
    %190 = arith.mulf %187, %189 : vector<4x32xf32>
    %191 = arith.addf %186, %190 : vector<4x32xf32>
    %192 = vector.extract_strided_slice %177 {offsets = [2, 0], sizes = [4, 32], strides = [1, 1]} : vector<10x32xf32> to vector<4x32xf32>
    %193 = vector.extract_strided_slice %180 {offsets = [2, 0], sizes = [1, 32], strides = [1, 1]} : vector<7x32xf32> to vector<1x32xf32>
    %194 = vector.broadcast %193 : vector<1x32xf32> to vector<4x32xf32>
    %195 = arith.mulf %192, %194 : vector<4x32xf32>
    %196 = arith.addf %191, %195 : vector<4x32xf32>
    %197 = vector.extract_strided_slice %177 {offsets = [3, 0], sizes = [4, 32], strides = [1, 1]} : vector<10x32xf32> to vector<4x32xf32>
    %198 = vector.extract_strided_slice %180 {offsets = [3, 0], sizes = [1, 32], strides = [1, 1]} : vector<7x32xf32> to vector<1x32xf32>
    %199 = vector.broadcast %198 : vector<1x32xf32> to vector<4x32xf32>
    %200 = arith.mulf %197, %199 : vector<4x32xf32>
    %201 = arith.addf %196, %200 : vector<4x32xf32>
    %202 = vector.extract_strided_slice %177 {offsets = [4, 0], sizes = [4, 32], strides = [1, 1]} : vector<10x32xf32> to vector<4x32xf32>
    %203 = vector.extract_strided_slice %180 {offsets = [4, 0], sizes = [1, 32], strides = [1, 1]} : vector<7x32xf32> to vector<1x32xf32>
    %204 = vector.broadcast %203 : vector<1x32xf32> to vector<4x32xf32>
    %205 = arith.mulf %202, %204 : vector<4x32xf32>
    %206 = arith.addf %201, %205 : vector<4x32xf32>
    %207 = vector.extract_strided_slice %177 {offsets = [5, 0], sizes = [4, 32], strides = [1, 1]} : vector<10x32xf32> to vector<4x32xf32>
    %208 = vector.extract_strided_slice %180 {offsets = [5, 0], sizes = [1, 32], strides = [1, 1]} : vector<7x32xf32> to vector<1x32xf32>
    %209 = vector.broadcast %208 : vector<1x32xf32> to vector<4x32xf32>
    %210 = arith.mulf %207, %209 : vector<4x32xf32>
    %211 = arith.addf %206, %210 : vector<4x32xf32>
    %212 = vector.extract_strided_slice %177 {offsets = [6, 0], sizes = [4, 32], strides = [1, 1]} : vector<10x32xf32> to vector<4x32xf32>
    %213 = vector.extract_strided_slice %180 {offsets = [6, 0], sizes = [1, 32], strides = [1, 1]} : vector<7x32xf32> to vector<1x32xf32>
    %214 = vector.broadcast %213 : vector<1x32xf32> to vector<4x32xf32>
    %215 = arith.mulf %212, %214 : vector<4x32xf32>
    %216 = arith.addf %211, %215 : vector<4x32xf32>
    %217 = vector.extract_strided_slice %182 {offsets = [0, 0], sizes = [1, 32], strides = [1, 1]} : vector<5x32xf32> to vector<1x32xf32>
    %218 = vector.broadcast %217 : vector<1x32xf32> to vector<4x32xf32>
    %219 = arith.addf %216, %218 : vector<4x32xf32>
    %220 = arith.mulf %219, %219 : vector<4x32xf32>
    %221 = arith.mulf %219, %220 : vector<4x32xf32>
    %cst_76 = arith.constant 4.471500e-02 : f32
    %222 = vector.broadcast %cst_76 : f32 to vector<4x32xf32>
    %223 = arith.mulf %222, %221 : vector<4x32xf32>
    %224 = arith.addf %219, %223 : vector<4x32xf32>
    %cst_77 = arith.constant 0.797884583 : f32
    %225 = vector.broadcast %cst_77 : f32 to vector<4x32xf32>
    %226 = arith.mulf %225, %224 : vector<4x32xf32>
    %227 = math.tanh %226 : vector<4x32xf32>
    %cst_78 = arith.constant 1.000000e+00 : f32
    %228 = vector.broadcast %cst_78 : f32 to vector<4x32xf32>
    %229 = arith.addf %228, %227 : vector<4x32xf32>
    %cst_79 = arith.constant 5.000000e-01 : f32
    %230 = vector.broadcast %cst_79 : f32 to vector<4x32xf32>
    %231 = arith.mulf %230, %229 : vector<4x32xf32>
    %232 = arith.mulf %219, %231 : vector<4x32xf32>
    %cst_80 = arith.constant 5.000000e-01 : f32
    %233 = vector.broadcast %cst_80 : f32 to vector<4x32xf32>
    %234 = arith.mulf %233, %232 : vector<4x32xf32>
    %235 = arith.addf %178, %234 : vector<4x32xf32>
    %236 = vector.extract_strided_slice %182 {offsets = [1, 0], sizes = [1, 32], strides = [1, 1]} : vector<5x32xf32> to vector<1x32xf32>
    %237 = vector.broadcast %236 : vector<1x32xf32> to vector<4x32xf32>
    %238 = arith.mulf %235, %237 : vector<4x32xf32>
    %239 = vector.extract_strided_slice %182 {offsets = [2, 0], sizes = [1, 32], strides = [1, 1]} : vector<5x32xf32> to vector<1x32xf32>
    %240 = vector.broadcast %239 : vector<1x32xf32> to vector<4x32xf32>
    %241 = arith.addf %238, %240 : vector<4x32xf32>
    %242 = arith.truncf %241 : vector<4x32xf32> to vector<4x32xbf16>
    %c2_81 = arith.constant 2 : index
    %c0_82 = arith.constant 0 : index
    %c0_83 = arith.constant 0 : index
    %243 = vector.load %arg7[%c2_81, %c0_82, %c0_83] : memref<3x32x64xbf16, #tpu.memory_space<vmem>>, vector<1x32x64xbf16>
    %244 = vector.shape_cast %243 : vector<1x32x64xbf16> to vector<32x64xbf16>
    %cst_84 = arith.constant dense<0.000000e+00> : vector<4x64xf32>
    %245 = tpu.matmul %242, %244, %cst_84 {dimension_numbers = #tpu.dot_dimension_numbers<[1], [0], [0], [1], [0, 0, 1, 1], [], []>} : vector<4x32xbf16>, vector<32x64xbf16>, vector<4x64xf32> -> vector<4x64xf32>
    %c2_85 = arith.constant 2 : index
    %c0_86 = arith.constant 0 : index
    %c0_87 = arith.constant 0 : index
    %246 = vector.load %arg6[%c2_85, %c0_86, %c0_87] : memref<3x1x64xf32, #tpu.memory_space<vmem>>, vector<1x1x64xf32>
    %247 = vector.shape_cast %246 : vector<1x1x64xf32> to vector<1x64xf32>
    %248 = vector.broadcast %247 : vector<1x64xf32> to vector<4x64xf32>
    %249 = arith.addf %245, %248 : vector<4x64xf32>
    %250 = arith.mulf %249, %249 : vector<4x64xf32>
    %251 = arith.mulf %249, %250 : vector<4x64xf32>
    %cst_88 = arith.constant 4.471500e-02 : f32
    %252 = vector.broadcast %cst_88 : f32 to vector<4x64xf32>
    %253 = arith.mulf %252, %251 : vector<4x64xf32>
    %254 = arith.addf %249, %253 : vector<4x64xf32>
    %cst_89 = arith.constant 0.797884583 : f32
    %255 = vector.broadcast %cst_89 : f32 to vector<4x64xf32>
    %256 = arith.mulf %255, %254 : vector<4x64xf32>
    %257 = math.tanh %256 : vector<4x64xf32>
    %cst_90 = arith.constant 1.000000e+00 : f32
    %258 = vector.broadcast %cst_90 : f32 to vector<4x64xf32>
    %259 = arith.addf %258, %257 : vector<4x64xf32>
    %cst_91 = arith.constant 5.000000e-01 : f32
    %260 = vector.broadcast %cst_91 : f32 to vector<4x64xf32>
    %261 = arith.mulf %260, %259 : vector<4x64xf32>
    %262 = arith.mulf %249, %261 : vector<4x64xf32>
    %263 = arith.truncf %262 : vector<4x64xf32> to vector<4x64xbf16>
    %c2_92 = arith.constant 2 : index
    %c0_93 = arith.constant 0 : index
    %c0_94 = arith.constant 0 : index
    %264 = vector.load %arg8[%c2_92, %c0_93, %c0_94] : memref<3x64x32xbf16, #tpu.memory_space<vmem>>, vector<1x64x32xbf16>
    %265 = vector.shape_cast %264 : vector<1x64x32xbf16> to vector<64x32xbf16>
    %cst_95 = arith.constant dense<0.000000e+00> : vector<4x32xf32>
    %266 = tpu.matmul %263, %265, %cst_95 {dimension_numbers = #tpu.dot_dimension_numbers<[1], [0], [0], [1], [0, 0, 1, 1], [], []>} : vector<4x64xbf16>, vector<64x32xbf16>, vector<4x32xf32> -> vector<4x32xf32>
    %267 = arith.addf %241, %266 : vector<4x32xf32>
    %268 = vector.extract_strided_slice %182 {offsets = [3, 0], sizes = [1, 32], strides = [1, 1]} : vector<5x32xf32> to vector<1x32xf32>
    %269 = vector.broadcast %268 : vector<1x32xf32> to vector<4x32xf32>
    %270 = arith.mulf %267, %269 : vector<4x32xf32>
    %271 = vector.extract_strided_slice %182 {offsets = [4, 0], sizes = [1, 32], strides = [1, 1]} : vector<5x32xf32> to vector<1x32xf32>
    %272 = vector.broadcast %271 : vector<1x32xf32> to vector<4x32xf32>
    %273 = arith.addf %270, %272 : vector<4x32xf32>
    %cst_96 = arith.constant dense<0xFF800000> : vector<32xf32>
    %274 = vector.multi_reduction <maximumf>, %273, %cst_96 [0] : vector<4x32xf32> to vector<32xf32>
    %275 = vector.shape_cast %274 : vector<32xf32> to vector<1x32xf32>
    %276 = arith.truncf %275 : vector<1x32xf32> to vector<1x32xbf16>
    %c0_97 = arith.constant 0 : index
    %c0_98 = arith.constant 0 : index
    %277 = vector.load %arg9[%c0_97, %c0_98] : memref<32x128xbf16, #tpu.memory_space<vmem>>, vector<32x128xbf16>
    %cst_99 = arith.constant dense<0.000000e+00> : vector<1x128xf32>
    %278 = tpu.matmul %276, %277, %cst_99 {dimension_numbers = #tpu.dot_dimension_numbers<[1], [0], [0], [1], [0, 0, 1, 1], [], []>} : vector<1x32xbf16>, vector<32x128xbf16>, vector<1x128xf32> -> vector<1x128xf32>
    %c0_100 = arith.constant 0 : index
    %c0_101 = arith.constant 0 : index
    %279 = vector.load %arg10[%c0_100, %c0_101] : memref<1x128xf32, #tpu.memory_space<vmem>>, vector<1x128xf32>
    %280 = arith.addf %278, %279 : vector<1x128xf32>
    %c0_102 = arith.constant 0 : index
    %c0_103 = arith.constant 0 : index
    %c0_104 = arith.constant 0 : index
    %281 = vector.load %arg11[%c0_102, %c0_103, %c0_104] : memref<1x1x128xf32, #tpu.memory_space<vmem>>, vector<1x1x128xf32>
    %282 = vector.shape_cast %281 : vector<1x1x128xf32> to vector<1x128xf32>
    %283 = vector.shape_cast %280 : vector<1x128xf32> to vector<1x1x128xf32>
    tpu.vector_store %arg11[%c0_102, %c0_103, %c0_104], %283 {strides = array<i32>} : memref<1x1x128xf32, #tpu.memory_space<vmem>>, vector<1x1x128xf32>,
    return
  }
  func.func @transform_0(%arg0: i32) -> (i32, i32, i32) {
    %c0_i32 = arith.constant 0 : i32
    %c0_i32_0 = arith.constant 0 : i32
    %c0_i32_1 = arith.constant 0 : i32
    return %arg0, %c0_i32, %c0_i32_0 : i32, i32, i32
  }
  func.func @transform_1(%arg0: i32) -> (i32, i32) {
    %c0_i32 = arith.constant 0 : i32
    %c0_i32_0 = arith.constant 0 : i32
    %c0_i32_1 = arith.constant 0 : i32
    return %c0_i32, %c0_i32_0 : i32, i32
  }
  func.func @transform_2(%arg0: i32) -> (i32, i32) {
    %c0_i32 = arith.constant 0 : i32
    %c0_i32_0 = arith.constant 0 : i32
    %c0_i32_1 = arith.constant 0 : i32
    return %c0_i32, %c0_i32_0 : i32, i32
  }
  func.func @transform_3(%arg0: i32) -> (i32, i32, i32) {
    %c0_i32 = arith.constant 0 : i32
    %c0_i32_0 = arith.constant 0 : i32
    %c0_i32_1 = arith.constant 0 : i32
    %c0_i32_2 = arith.constant 0 : i32
    return %c0_i32, %c0_i32_0, %c0_i32_1 : i32, i32, i32
  }
  func.func @transform_4(%arg0: i32) -> (i32, i32, i32) {
    %c0_i32 = arith.constant 0 : i32
    %c0_i32_0 = arith.constant 0 : i32
    %c0_i32_1 = arith.constant 0 : i32
    %c0_i32_2 = arith.constant 0 : i32
    return %c0_i32, %c0_i32_0, %c0_i32_1 : i32, i32, i32
  }
  func.func @transform_5(%arg0: i32) -> (i32, i32, i32) {
    %c0_i32 = arith.constant 0 : i32
    %c0_i32_0 = arith.constant 0 : i32
    %c0_i32_1 = arith.constant 0 : i32
    %c0_i32_2 = arith.constant 0 : i32
    return %c0_i32, %c0_i32_0, %c0_i32_1 : i32, i32, i32
  }
  func.func @transform_6(%arg0: i32) -> (i32, i32, i32) {
    %c0_i32 = arith.constant 0 : i32
    %c0_i32_0 = arith.constant 0 : i32
    %c0_i32_1 = arith.constant 0 : i32
    %c0_i32_2 = arith.constant 0 : i32
    return %c0_i32, %c0_i32_0, %c0_i32_1 : i32, i32, i32
  }
  func.func @transform_7(%arg0: i32) -> (i32, i32, i32) {
    %c0_i32 = arith.constant 0 : i32
    %c0_i32_0 = arith.constant 0 : i32
    %c0_i32_1 = arith.constant 0 : i32
    %c0_i32_2 = arith.constant 0 : i32
    return %c0_i32, %c0_i32_0, %c0_i32_1 : i32, i32, i32
  }
  func.func @transform_8(%arg0: i32) -> (i32, i32) {
    %c0_i32 = arith.constant 0 : i32
    %c0_i32_0 = arith.constant 0 : i32
    %c0_i32_1 = arith.constant 0 : i32
    return %c0_i32, %c0_i32_0 : i32, i32
  }
  func.func @transform_9(%arg0: i32) -> (i32, i32) {
    %c0_i32 = arith.constant 0 : i32
    %c0_i32_0 = arith.constant 0 : i32
    %c0_i32_1 = arith.constant 0 : i32
    return %c0_i32, %c0_i32_0 : i32, i32
  }
  func.func @transform_10(%arg0: i32) -> (i32, i32, i32) {
    %c0_i32 = arith.constant 0 : i32
    %c0_i32_0 = arith.constant 0 : i32
    %c0_i32_1 = arith.constant 0 : i32
    return %arg0, %c0_i32, %c0_i32_0 : i32, i32, i32
  }
}

</mosaic_0001>

<bundles_post_ra>
// kernel: tpu_custom_call.1
= control target key start
LH: loop header
LB: loop body
LE: loop exit
PB: predicated region body
PF: predicated region fallthrough
CT: control target
= control target key end

     0   :  { %15 = vsyncpa [#allocation4], 0  ;;  %s2032_s0 = inlined_call_operand.vmem [shape: f32[2,4,32], index: 0, kind: input, shape index: {}]   ;;  %s2033_s1 = inlined_call_operand.vmem [shape: bf16[32,32], index: 1, kind: input, shape index: {}]   ;;  %s2034_s2 = inlined_call_operand.vmem [shape: f32[1,32], index: 2, kind: input, shape index: {}]   ;;  %s2035_s3 = inlined_call_operand.vmem [shape: f32[3,7,32], index: 3, kind: input, shape index: {}]   ;;  %s2036_s4 = inlined_call_operand.vmem [shape: f32[3,5,32], index: 4, kind: input, shape index: {}]   ;;  %s2037_s5 = inlined_call_operand.vmem [shape: f32[3,1,64], index: 5, kind: input, shape index: {}]   ;;  %s2038_s6 = inlined_call_operand.vmem [shape: bf16[3,32,64], index: 6, kind: input, shape index: {}]   ;;  %s2039_s7 = inlined_call_operand.vmem [shape: bf16[3,64,32], index: 7, kind: input, shape index: {}]   ;;  %s2040_s8 = inlined_call_operand.vmem [shape: bf16[32,128], index: 8, kind: input, shape index: {}]   ;;  %s2041_s9 = inlined_call_operand.vmem [shape: f32[1,128], index: 9, kind: input, shape index: {}]   ;;  %s2042_s10 = inlined_call_operand.hbm [shape: f32[2,1,128], index: 10, kind: output, shape index: {}]  }
   0x1   :  { %17 = vsyncpa [#allocation4 + $0x1], 0  ;;  %s1713_s13 = smov 0   ;;  %s1715_s14 = smov 0  }
   0x2   :  { %s1717_s15 = smov 0   ;;  %s1719_s16 = smov 0  }
   0x3 LB: > { %s1734_s17 = sadd.s32 4294967295, %s1653_s16   ;;  %s1338_s18 = sadd.s32 4294967294, %s1653_s16   ;;  %s1653_s16 = sphi %s1719_s16, %s2048_s16   ;;  %s1649_s15 = sphi %s1717_s15, %s2047_s15   ;;  %s1645_s14 = sphi %s1715_s14, %s2046_s14   ;;  %s1641_s13 = sphi %s1713_s13, %s2045_s13  }
   0x4   : > { %s1738_s19 = sadd.s32 1, %s1653_s16   ;;  %s245_s20 = sadd.s32 1, %s1649_s15 }
   0x5   : > { %s242_s21 = ssub.s32 %s1653_s16, %s1738_s19  ;;  %p255_p0 = scmp.ne.s32.totalorder %s1649_s15, %s1645_s14 }
   0x6   : > { %p243_p1 = scmp.eq.s32.totalorder %s242_s21, 0  ;;  %p256_p2 = scmp.eq.s32.totalorder %s1734_s17, 1 }
   0x7   : > { %p261_p3 = scmp.ne.s32.totalorder %s1645_s14, %s1641_s13  ;;  %p262_p4 = scmp.eq.s32.totalorder %s1338_s18, 1 }
   0x8   : > { %s1749_s22 = scalar_select %p243_p1, %s1649_s15, %s245_s20  }
   0x9   : > { %p1751_p5 = por %p256_p2, %p255_p0  ;;  %p1755_p6 = por %p262_p4, %p261_p3 }
   0xa   : > { %p1341_p7 = scmp.ge.s32.totalorder %s1653_s16, 1  ;;  %p314_p8 = scmp.lt.s32.totalorder %s1653_s16, 3 }
   0xc   : > { %p315_p9 = pnand %p1341_p7, %p314_p8 }
   0xd   : > { %v1557_v0 = vld [vmem:[%s2033_s1] sm:$0xff] (!%p315_p9)   ;;  %v1655_v1 = vmov (!%p315_p9), 0.0   ;;  %v1558_v2 = vld [vmem:[%s2033_s1 + $0x8] sm:$0xff] (!%p315_p9)   ;;  %vm1656_vm0 = vmmov (!%p315_p9), 0   ;;  %p350_p10 = scmp.lt.s32.totalorder (!%p315_p9), %s1734_s17, 1  ;;  %vm355_vm1 = vcmask (!%p315_p9), 261120   ;;  %v432_v7 = vlaneseq (!%p315_p9) }
   0xe   : > { %318 = sbr.rel (%p315_p9) target bundleno = 2075 (0x81b), region = 60  ;;  %1440 = vmatprep.subr.bf16.mxu0 (!%p315_p9), %v1655_v1  ;;  %1448 = vmatprep.subr.bf16.mxu1 (!%p315_p9), %v1655_v1  ;;  %356 = vst.msk [vmem:[#allocation2] sm:$0xff] (!%p315_p9), %vm355_vm1, %v1655_v1  ;;  %v1559_v5 = vld [vmem:[%s2038_s6] sm:$0xff] (!%p315_p9)   ;;  %v1560_v6 = vld [vmem:[%s2038_s6 + $0x8] sm:$0xff] (!%p315_p9)   ;;  %vm427_vm2 = vcmask (!%p315_p9), 257024   ;;  %v1563_v57 = vld [vmem:[%s2039_s7 + $0x10] sm:$0xff] (!%p315_p9)  }
   0xf   : > { %1441 = vmatpush3.bf16.msra.mxu0 (!%p315_p9), %v1557_v0  ;;  %1444 = vmatprep.mubr.msk.bf16.mxu0 (!%p315_p9), %vm1656_vm0, %v1655_v1  ;;  %v1343_v8 = vld [vmem:[%s2034_s2] ss:$0 sm:$0xff] (!%p315_p9)  ;;  %v1796_v9 = vshrl.u32 (!%p315_p9), %v432_v7, 7  ;;  %v1562_v56 = vld [vmem:[%s2039_s7 + $0x8] sm:$0xff] (!%p315_p9)   ;;  %v1564_v58 = vld [vmem:[%s2039_s7 + $0x18] sm:$0xff] (!%p315_p9)   ;;  %vm357_vm3 = vcmask (!%p315_p9), 254976  }
  0x10   : > { %1442 = vmatprep.subr.bf16.mxu0 (!%p315_p9), %v1655_v1  ;;  %1452 = vmatprep.mubr.msk.bf16.mxu1 (!%p315_p9), %vm1656_vm0, %v1655_v1  ;;  %v430_v17 = vld [vmem:[%s2035_s3] sm:$0x7f] (!%p315_p9)  ;;  %358 = vst.msk [vmem:[#allocation2 + $0x8] sm:$0x3] (!%p315_p9), %vm357_vm3, %v1655_v1  ;;  %vm601_vm4 = vcmask (!%p315_p9), 523264   ;;  %vm659_vm5 = vcmask (!%p315_p9), 260099  }
  0x11   : > { %1449 = vmatpush3.bf16.msra.mxu1 (!%p315_p9), %v1559_v5  ;;  %v1799_v15 = vsub.s32 (!%p315_p9), 1, %v1796_v9  ;;  %v1802_v16 = vsub.s32 (!%p315_p9), 2, %v1796_v9  ;;  %v1808_v18 = vsub.s32 (!%p315_p9), 0, %v1796_v9  ;;  %v1816_v25 = vld [vmem:[%s2036_s4] sm:$0x1f] (!%p315_p9)  ;;  %vm707_vm6 = vcmask (!%p315_p9), 1043456  }
  0x12   : > { %1450 = vmatprep.subr.bf16.mxu1 (!%p315_p9), %v1655_v1  ;;  %v1561_v55 = vld [vmem:[%s2039_s7] sm:$0xff] (!%p315_p9)   ;;  %vm975_vm7 = vcmask (!%p315_p9), 1042432   ;;  %vm989_vm8 = vcmask (!%p315_p9), 1041408   ;;  %s348_s28 = sand.u32 (!%p315_p9), 1, %s1645_s14   ;;  %s1407_s11 = sshll.u32 (!%p315_p9), %s1734_s17, 4 }
  0x13   : > { %1443 = vmatpush3.bf16.msra.mxu0 (!%p315_p9), %v1558_v2  ;;  %v440_v19 = vrot.slane (!%p315_p9), %v430_v17, %v1799_v15  ;;  %v449_v20 = vrot.slane (!%p315_p9), %v430_v17, %v1802_v16  ;;  %v435_v21 = vrot.slane (!%p315_p9), %v430_v17, %v1808_v18  ;;  %v458_v30 = vrot.slane (!%p315_p9), %v1816_v25, %v1808_v18  ;;  %v1347_v59 = vld [vmem:[%s2037_s5] ss:$0 sm:$0xff] (!%p315_p9)  ;;  %s349_s12 = scalar_lea.vmem (!%p315_p9), [#allocation3], %s348_s28  ;;  %s1990_s25 = scalar_lea.hbm (!%p315_p9), %s2042_s10, %s1407_s11 }
  0x14   : > { %1456 = vmatprep.subr.bf16.mxu0 (!%p315_p9), %v1655_v1  ;;  %v477_v44 = vrot.slane (!%p315_p9), %v1816_v25, %v1799_v15  ;;  %v482_v46 = vrot.slane (!%p315_p9), %v1816_v25, %v1802_v16  ;;  %v1859_v17 = vsub.s32 (!%p315_p9), 3, %v1796_v9  ;;  %s1271_s26 = scalar_lea.sflag (!%p315_p9), [#allocation4], %s348_s28  ;;  %s1657_s27 = smov (!%p315_p9), [#allocation3]  }
  0x15   : > { %s351_s29 = scalar_select %p350_p10, %s1734_s17, 1  ;;  %1451 = vmatpush3.bf16.msra.mxu1 %v1560_v6 }
  0x16   : > { %1468 = vmatprep.subr.bf16.mxu1 %v1655_v1 }
  0x17   : > { %s1342_s30 = sshll.u32 %s351_s29, 2  ;;  %s1595_s29 = sshll.u32 %s1657_s27, 4  ;;  %s1596_s29 = int_to_ptr.vmem [resolvable:$false] %s1595_s29 }
  0x18   : > { %s353_s18 = scalar_lea.vmem %s2032_s0, %s1342_s30  ;;  %s1597_s30 = scalar_lea.vmem %s1596_s29, 32 }
  0x19   : > { %v359_v3 = vld [vmem:[%s353_s18] sm:$0xf]  ;;  %s1283_s18 = sshll.u32 %s349_s12, 4  ;;  %s1992_s18 = int_to_ptr.vmem [resolvable:$true] %s1283_s18 }
  0x1a   : > { %v360_v4 = vpack.c.bf16 %v359_v3, %v359_v3  ;;  %s1591_s17 = scalar_lea.vmem %s1992_s18, 16  ;;  %p1598_p0 = scmp.lt.s32.totalorder %s1992_s18, %s1596_s29 }
  0x1b   : > { %p1592_p11 = scmp.ne.s32.totalorder %s1992_s18, %s1591_s17  ;;  %p1599_p1 = scmp.lt.s32.totalorder %s1597_s30, %s1591_s17 }
  0x1c   : > { %1445 = vmatmul.mubr.msk.bf16.vlgmr.msra.gmra.mrb[0].mxu0 %vm355_vm1, %v360_v4 }
  0x1d   : > { %1464 = vmatprep.mubr.msk.bf16.mxu0 %vm1656_vm0, %v1655_v1  ;;  %1457 = vmatpush3.bf16.msra.mxu0 %v1561_v55  ;;  %p1593_p12 = pnand %p1592_p11, %p1751_p5  ;;  %p1600_p2 = por %p1599_p1, %p1598_p0 }
  0x1e   : > { %1458 = vmatprep.subr.bf16.mxu0 %v1655_v1 }
  0x1f   : > { %p1594_p13 = pneg %p1593_p12 }
  0x21   : > { %1459 = vmatpush3.bf16.msra.mxu0 %v1562_v56  ;;  %p1601_p3 = pnand %p1600_p2, %p1594_p13 }
  0x22   : > { %1460 = vmatprep.subr.bf16.mxu0 %v1655_v1 }
  0x25   : > { %1461 = vmatpush3.bf16.msra.mxu0 %v1563_v57 }
  0x26   : > { %1462 = vmatprep.subr.bf16.mxu0 %v1655_v1 }
  0x29   : > { %1463 = vmatpush3.bf16.msra.mxu0 %v1564_v58 }
  0x2a   : > { %1488 = vmatprep.subr.bf16.mxu0 %v1655_v1 }
  0xef   : > { %v421_v10 = vpop.f32.mrb[0].mxu0 }
  0xf0   : > { %v422_v11 = vadd.f32 %v1343_v8, %v421_v10  ;;  %v1446_v12 = vpop.f32.mrb[1].mxu0 }
  0xf1   : > { %v424_v13 = vpop.f32.mrb[2].mxu0 }
  0xf2   : > { %428 = vst.msk [vmem:[#allocation2 + $0x3] sm:$0xf] %vm427_vm2, %v422_v11  ;;  %v1447_v14 = vpop.f32.mrb[3].mxu0  ;;  %v1565_v13 = vld [vmem:[%s2038_s6 + $0x10] sm:$0xff]  }
  0xf3   : > { %v1566_v14 = vld [vmem:[%s2038_s6 + $0x18] sm:$0xff]  }
  0xf9   : > { %v429_v22 = vld [vmem:[#allocation2] sm:$0xff] }
  0xfa   : > { %v441_v23 = vmul.f32 %v440_v19, %v429_v22  ;;  %v450_v24 = vmul.f32 %v449_v20, %v429_v22  ;;  %v436_v26 = vmul.f32 %v435_v21, %v429_v22  ;;  %v1862_v19 = vsub.s32 4, %v1796_v9 }
  0xfc   : > { %v443_v27 = vrot.slane %v441_v23, 1  ;;  %v452_v29 = vrot.slane %v450_v24, 2 }
  0xfe   : > { %v445_v28 = vadd.f32 %v443_v27, %v436_v26  ;;  %v657_v27 = vrot.slane %v1816_v25, %v1862_v19 }
 0x100   : > { %v454_v31 = vadd.f32 %v452_v29, %v445_v28 }
 0x102   : > { %v459_v32 = vadd.f32 %v458_v30, %v454_v31  ;;  %v1356_v31 = vld [vmem:[%s2035_s3 + $0x8] sm:$0x7f] }
 0x104   : > { %v460_v33 = vmul.f32 %v459_v32, %v459_v32 }
 0x106   : > { %v461_v34 = vmul.f32 %v460_v33, %v459_v32  ;;  %v684_v33 = vrot.slane %v1356_v31, %v1802_v16 }
 0x108   : > { %v462_v35 = vmul.f32 0.044715, %v461_v34  ;;  %v702_v34 = vrot.slane %v1356_v31, %v1862_v19 }
 0x10a   : > { %v463_v36 = vadd.f32 %v462_v35, %v459_v32  ;;  %v662_v35 = vld [vmem:[#allocation2 + $0x8] sm:$0x3] }
 0x10c   : > { %v464_v37 = vmul.f32 0.7978846, %v463_v36  ;;  %v670_v36 = vrot.slane %v1356_v31, %v1808_v18 }
 0x10e   : > { %1579 = vtanh.f32 %v464_v37 }
 0x118   : > { %v1580_v38 = vpop.eup %1579 }
 0x119   : > { %v466_v39 = vadd.f32 1.0, %v1580_v38 }
 0x11b   : > { %v467_v40 = vmul.f32 0.5, %v466_v39 }
 0x11d   : > { %v468_v41 = vmul.f32 %v467_v40, %v459_v32  ;;  %v675_v32 = vrot.slane %v1356_v31, %v1799_v15 }
 0x11f   : > { %v469_v42 = vmul.f32 0.5, %v468_v41  ;;  %v704_v41 = vmul.f32 %v702_v34, %v662_v35 }
 0x121   : > { %v471_v43 = vrot.slane %v469_v42, 7 }
 0x123   : > { %v473_v45 = vadd.f32 %v471_v43, %v429_v22  ;;  %v652_v22 = vrot.slane %v1816_v25, %v1859_v17  ;;  %v693_v25 = vrot.slane %v1356_v31, %v1859_v17 }
 0x125   : > { %v478_v47 = vmul.f32 %v477_v44, %v473_v45 }
 0x127   : > { %v483_v48 = vadd.f32 %v482_v46, %v478_v47 }
 0x129   : > { %v484_v49 = vpack.c.bf16 %v483_v48, %v483_v48 }
 0x12b   : > { %v497_v50 = vshrl.u32 %v484_v49, 16  ;;  %v500_v51 = vshll.u32 %v484_v49, 16  ;;  %v1880_v49 = vld [vmem:[%s2036_s4 + $0x8] sm:$0x1f] }
 0x12d   : > { %v499_v52 = vrot.slane %v497_v50, 1  ;;  %v502_v53 = vrot.slane %v500_v51, 2 }
 0x12f   : > { %v503_v54 = vor.u32 %v502_v53, %v499_v52  ;;  %v716_v53 = vrot.slane %v1880_v49, %v1808_v18 }
 0x131   : > { %1453 = vmatmul.mubr.msk.bf16.vlgmr.msra.gmra.mrb[0].mxu1 %vm355_vm1, %v503_v54 }
 0x132   : > { %1472 = vmatprep.mubr.msk.bf16.mxu1 %vm1656_vm0, %v1655_v1  ;;  %1469 = vmatpush3.bf16.msra.mxu1 %v1565_v13 }
 0x133   : > { %1470 = vmatprep.subr.bf16.mxu1 %v1655_v1 }
 0x136   : > { %1471 = vmatpush3.bf16.msra.mxu1 %v1566_v14 }
 0x137   : > { %1476 = vmatprep.subr.bf16.mxu1 %v1655_v1 }
 0x204   : > { %v553_v60 = vpop.f32.mrb[0].mxu1 }
 0x205   : > { %v554_v61 = vadd.f32 %v1347_v59, %v553_v60  ;;  %v1454_v62 = vpop.f32.mrb[1].mxu1 }
 0x206   : > { %v556_v63 = vpop.f32.mrb[2].mxu1 }
 0x207   : > { %v559_v0 = vmul.f32 %v554_v61, %v554_v61  ;;  %v1455_v2 = vpop.f32.mrb[3].mxu1 }
 0x209   : > { %v560_v3 = vmul.f32 %v559_v0, %v554_v61 }
 0x20b   : > { %v561_v4 = vmul.f32 0.044715, %v560_v3 }
 0x20d   : > { %v562_v5 = vadd.f32 %v561_v4, %v554_v61 }
 0x20f   : > { %v563_v6 = vmul.f32 0.7978846, %v562_v5  ;;  %v735_v5 = vrot.slane %v1880_v49, %v1799_v15 }
 0x211   : > { %1581 = vtanh.f32 %v563_v6 }
 0x21b   : > { %v1582_v7 = vpop.eup %1581 }
 0x21c   : > { %v565_v8 = vadd.f32 1.0, %v1582_v7  ;;  %v740_v7 = vrot.slane %v1880_v49, %v1802_v16 }
 0x21e   : > { %v566_v10 = vmul.f32 0.5, %v565_v8 }
 0x220   : > { %v567_v11 = vmul.f32 %v566_v10, %v554_v61 }
 0x222   : > { %v568_v12 = vpack.c.bf16 %v567_v11, %v567_v11 }
 0x224   : > { %1465 = vmatmul.mubr.msk.bf16.vlgmr.msra.gmra.mrb[4].mxu0 %vm601_vm4, %v568_v12 }
 0x225   : > { %1492 = vmatprep.mubr.msk.bf16.mxu0 %vm1656_vm0, %v1655_v1 }
 0x2f7   : > { %v639_v20 = vpop.f32.mrb[4].mxu0 }
 0x2f8   : > { %v646_v21 = vrot.slane %v639_v20, 5  ;;  %v1466_v23 = vpop.f32.mrb[5].mxu0 }
 0x2f9   : > { %v642_v24 = vpop.f32.mrb[6].mxu0  ;;  %v1568_v23 = vld [vmem:[%s2039_s7 + $0x28] sm:$0xff]  }
 0x2fa   : > { %v648_v26 = vadd.f32 %v646_v21, %v483_v48  ;;  %v1467_v28 = vpop.f32.mrb[7].mxu0  ;;  %v709_v48 = vrot.slane %v704_v41, 4  ;;  %v1569_v24 = vld [vmem:[%s2039_s7 + $0x30] sm:$0xff]  }
 0x2fc   : > { %v653_v29 = vmul.f32 %v652_v22, %v648_v26  ;;  %v1567_v22 = vld [vmem:[%s2039_s7 + $0x20] sm:$0xff]   ;;  %v1570_v26 = vld [vmem:[%s2039_s7 + $0x38] sm:$0xff]  }
 0x2fe   : > { %v658_v30 = vadd.f32 %v657_v27, %v653_v29  ;;  %v1363_v27 = vld [vmem:[%s2037_s5 + $0x1] ss:$0 sm:$0xff] }
 0x300   : > { %660 = vst.msk [vmem:[#allocation2] sm:$0x78] %vm659_vm5, %v658_v30 }
 0x307   : > { %v661_v37 = vld [vmem:[#allocation2] sm:$0xff] }
 0x308   : > { %v676_v38 = vmul.f32 %v675_v32, %v661_v37  ;;  %v685_v39 = vmul.f32 %v684_v33, %v661_v37  ;;  %v703_v40 = vmul.f32 %v702_v34, %v661_v37  ;;  %v671_v42 = vmul.f32 %v670_v36, %v661_v37 }
 0x309   : > { %v694_v44 = vmul.f32 %v693_v25, %v661_v37 }
 0x30a   : > { %v678_v43 = vrot.slane %v676_v38, 1  ;;  %v687_v46 = vrot.slane %v685_v39, 2  ;;  %v708_v47 = vrot.slane %v703_v40, 4 }
 0x30b   : > { %v696_v51 = vrot.slane %v694_v44, 3 }
 0x30c   : > { %v680_v45 = vadd.f32 %v678_v43, %v671_v42  ;;  %v710_v54 = vsel %vm707_vm6, %v708_v47, %v709_v48  ;;  %v1571_v42 = vld [vmem:[%s2038_s6 + $0x20] sm:$0xff]   ;;  %v1572_v43 = vld [vmem:[%s2038_s6 + $0x28] sm:$0xff]  }
 0x30d   : > { %1489 = vmatpush3.bf16.msra.mxu0 %v1571_v42 }
 0x30e   : > { %v689_v50 = vadd.f32 %v687_v46, %v680_v45  ;;  %1490 = vmatprep.subr.bf16.mxu0 %v1655_v1  ;;  %v912_v46 = vrot.slane %v1880_v49, %v1859_v17 }
 0x310   : > { %v698_v52 = vadd.f32 %v696_v51, %v689_v50  ;;  %v917_v51 = vrot.slane %v1880_v49, %v1862_v19 }
 0x311   : > { %1491 = vmatpush3.bf16.msra.mxu0 %v1572_v43 }
 0x312   : > { %v712_v55 = vadd.f32 %v710_v54, %v698_v52  ;;  %1496 = vmatprep.subr.bf16.mxu0 %v1655_v1 }
 0x314   : > { %v717_v56 = vadd.f32 %v716_v53, %v712_v55  ;;  %v1380_v55 = vld [vmem:[%s2035_s3 + $0x10] sm:$0x7f] }
 0x315   : > { %v929_v49 = vrot.slane %v1380_v55, %v1808_v18 }
 0x316   : > { %v718_v57 = vmul.f32 %v717_v56, %v717_v56 }
 0x318   : > { %v719_v58 = vmul.f32 %v718_v57, %v717_v56  ;;  %v934_v57 = vrot.slane %v1380_v55, %v1799_v15 }
 0x31a   : > { %v720_v59 = vmul.f32 0.044715, %v719_v58  ;;  %v943_v58 = vrot.slane %v1380_v55, %v1802_v16 }
 0x31c   : > { %v721_v60 = vadd.f32 %v720_v59, %v717_v56  ;;  %v983_v59 = vsub.s32 6, %v1796_v9 }
 0x31e   : > { %v722_v61 = vmul.f32 0.7978846, %v721_v60  ;;  %v952_v60 = vrot.slane %v1380_v55, %v1859_v17 }
 0x320   : > { %1583 = vtanh.f32 %v722_v61 }
 0x32a   : > { %v1584_v62 = vpop.eup %1583 }
 0x32b   : > { %v724_v63 = vadd.f32 1.0, %v1584_v62 }
 0x32d   : > { %v725_v0 = vmul.f32 0.5, %v724_v63  ;;  %v961_v63 = vrot.slane %v1380_v55, %v1862_v19 }
 0x32f   : > { %v726_v2 = vmul.f32 %v725_v0, %v717_v56  ;;  %v969_v56 = vsub.s32 5, %v1796_v9  ;;  %v921_v0 = vld [vmem:[#allocation2 + $0x8] sm:$0x3] }
 0x331   : > { %v727_v3 = vmul.f32 0.5, %v726_v2  ;;  %v970_v62 = vrot.slane %v1380_v55, %v969_v56 }
 0x333   : > { %v729_v4 = vrot.slane %v727_v3, 6 }
 0x335   : > { %v731_v6 = vadd.f32 %v729_v4, %v661_v37  ;;  %v984_v4 = vrot.slane %v1380_v55, %v983_v59  ;;  %v1576_v59 = vld [vmem:[%s2039_s7 + $0x58] sm:$0xff]  }
 0x337   : > { %v736_v8 = vmul.f32 %v735_v5, %v731_v6 }
 0x339   : > { %v741_v10 = vadd.f32 %v740_v7, %v736_v8 }
 0x33b   : > { %v742_v11 = vpack.c.bf16 %v741_v10, %v741_v10 }
 0x33d   : > { %v757_v12 = vshrl.u32 %v742_v11, 16  ;;  %v760_v13 = vshll.u32 %v742_v11, 16 }
 0x33f   : > { %v759_v14 = vrot.slane %v757_v12, 1  ;;  %v762_v20 = vrot.slane %v760_v13, 2 }
 0x341   : > { %v763_v21 = vor.u32 %v762_v20, %v759_v14  ;;  %v986_v14 = vmul.f32 %v984_v4, %v921_v0 }
 0x343   : > { %1473 = vmatmul.mubr.msk.bf16.vlgmr.msra.gmra.mrb[4].mxu1 %vm355_vm1, %v763_v21 }
 0x344   : > { %1484 = vmatprep.mubr.msk.bf16.mxu1 %vm1656_vm0, %v1655_v1  ;;  %1477 = vmatpush3.bf16.msra.mxu1 %v1567_v22 }
 0x345   : > { %1478 = vmatprep.subr.bf16.mxu1 %v1655_v1 }
 0x348   : > { %1479 = vmatpush3.bf16.msra.mxu1 %v1568_v23 }
 0x349   : > { %1480 = vmatprep.subr.bf16.mxu1 %v1655_v1 }
 0x34c   : > { %1481 = vmatpush3.bf16.msra.mxu1 %v1569_v24 }
 0x34d   : > { %1482 = vmatprep.subr.bf16.mxu1 %v1655_v1 }
 0x350   : > { %1483 = vmatpush3.bf16.msra.mxu1 %v1570_v26 }
 0x351   : > { %1508 = vmatprep.subr.bf16.mxu1 %v1655_v1 }
 0x416   : > { %v813_v28 = vpop.f32.mrb[4].mxu1 }
 0x417   : > { %v814_v29 = vadd.f32 %v1363_v27, %v813_v28  ;;  %v1474_v30 = vpop.f32.mrb[5].mxu1  ;;  %v1939_v27 = vld [vmem:[%s2036_s4 + $0x10] sm:$0x1f] }
 0x418   : > { %v816_v31 = vpop.f32.mrb[6].mxu1 }
 0x419   : > { %v819_v32 = vmul.f32 %v814_v29, %v814_v29  ;;  %v1475_v33 = vpop.f32.mrb[7].mxu1 }
 0x41a   : > { %v998_v33 = vrot.slane %v1939_v27, %v1808_v18  ;;  %v1022_v18 = vrot.slane %v1939_v27, %v1802_v16  ;;  %v1574_v16 = vld [vmem:[%s2039_s7 + $0x48] sm:$0xff]  }
 0x41b   : > { %v820_v34 = vmul.f32 %v819_v32, %v814_v29 }
 0x41d   : > { %v821_v35 = vmul.f32 0.044715, %v820_v34 }
 0x41f   : > { %v822_v36 = vadd.f32 %v821_v35, %v814_v29 }
 0x421   : > { %v823_v25 = vmul.f32 0.7978846, %v822_v36 }
 0x423   : > { %1585 = vtanh.f32 %v823_v25 }
 0x42d   : > { %v1586_v37 = vpop.eup %1585 }
 0x42e   : > { %v825_v38 = vadd.f32 1.0, %v1586_v37 }
 0x430   : > { %v826_v39 = vmul.f32 0.5, %v825_v38 }
 0x432   : > { %v827_v40 = vmul.f32 %v826_v39, %v814_v29  ;;  %v991_v29 = vrot.slane %v986_v14, 6 }
 0x434   : > { %v828_v41 = vpack.c.bf16 %v827_v40, %v827_v40 }
 0x436   : > { %1485 = vmatmul.mubr.msk.bf16.vlgmr.msra.gmra.mrb[8].mxu1 %vm601_vm4, %v828_v41 }
 0x437   : > { %1512 = vmatprep.mubr.msk.bf16.mxu1 %vm1656_vm0, %v1655_v1 }
 0x509   : > { %v899_v44 = vpop.f32.mrb[8].mxu1 }
 0x50a   : > { %v906_v45 = vrot.slane %v899_v44, 5  ;;  %v1486_v47 = vpop.f32.mrb[9].mxu1 }
 0x50b   : > { %v902_v48 = vpop.f32.mrb[10].mxu1  ;;  %v1017_v47 = vrot.slane %v1939_v27, %v1799_v15  ;;  %v1573_v15 = vld [vmem:[%s2039_s7 + $0x40] sm:$0xff]  }
 0x50c   : > { %v908_v50 = vadd.f32 %v906_v45, %v741_v10  ;;  %v1487_v52 = vpop.f32.mrb[11].mxu1  ;;  %v972_v10 = vmul.f32 %v970_v62, %v921_v0 }
 0x50e   : > { %v913_v53 = vmul.f32 %v912_v46, %v908_v50  ;;  %v977_v23 = vrot.slane %v972_v10, 5 }
 0x510   : > { %v918_v54 = vadd.f32 %v917_v51, %v913_v53 }
 0x512   : > { %919 = vst.msk [vmem:[#allocation2] sm:$0x78] %vm659_vm5, %v918_v54 }
 0x519   : > { %v920_v61 = vld [vmem:[#allocation2] sm:$0xff] }
 0x51a   : > { %v935_v2 = vmul.f32 %v934_v57, %v920_v61  ;;  %v944_v3 = vmul.f32 %v943_v58, %v920_v61  ;;  %v930_v5 = vmul.f32 %v929_v49, %v920_v61  ;;  %v953_v7 = vmul.f32 %v952_v60, %v920_v61  ;;  %v1575_v58 = vld [vmem:[%s2039_s7 + $0x50] sm:$0xff]   ;;  %v1387_v60 = vld [vmem:[%s2037_s5 + $0x2] ss:$0 sm:$0xff] }
 0x51b   : > { %v971_v8 = vmul.f32 %v970_v62, %v920_v61  ;;  %v962_v9 = vmul.f32 %v961_v63, %v920_v61  ;;  %v985_v13 = vmul.f32 %v984_v4, %v920_v61 }
 0x51c   : > { %v937_v6 = vrot.slane %v935_v2, 1  ;;  %v946_v12 = vrot.slane %v944_v3, 2  ;;  %v955_v21 = vrot.slane %v953_v7, 3 }
 0x51d   : > { %v976_v22 = vrot.slane %v971_v8, 5  ;;  %v964_v26 = vrot.slane %v962_v9, 4  ;;  %v990_v28 = vrot.slane %v985_v13, 6  ;;  %v1577_v9 = vld [vmem:[%s2040_s8] sm:$0xff]   ;;  %v1578_v13 = vld [vmem:[%s2040_s8 + $0x8] sm:$0xff]  }
 0x51e   : > { %v939_v11 = vadd.f32 %v937_v6, %v930_v5  ;;  %1509 = vmatpush3.bf16.msra.mxu1 %v1577_v9 }
 0x51f   : > { %v978_v31 = vsel %vm975_vm7, %v976_v22, %v977_v23  ;;  %v992_v34 = vsel %vm989_vm8, %v990_v28, %v991_v29  ;;  %1510 = vmatprep.subr.bf16.mxu1 %v1655_v1 }
 0x520   : > { %v948_v20 = vadd.f32 %v946_v12, %v939_v11 }
 0x522   : > { %v957_v24 = vadd.f32 %v955_v21, %v948_v20  ;;  %1511 = vmatpush3.bf16.msra.mxu1 %v1578_v13  ;;  %v1194_v21 = vrot.slane %v1939_v27, %v1859_v17 }
 0x524   : > { %v966_v30 = vadd.f32 %v964_v26, %v957_v24  ;;  %v1199_v26 = vrot.slane %v1939_v27, %v1862_v19  ;;  %v1213_v19 = vld [vmem:[%s2041_s9] sm:$0x1] }
 0x526   : > { %v980_v32 = vadd.f32 %v978_v31, %v966_v30 }
 0x528   : > { %v994_v35 = vadd.f32 %v992_v34, %v980_v32 }
 0x52a   : > { %v999_v36 = vadd.f32 %v998_v33, %v994_v35 }
 0x52c   : > { %v1000_v25 = vmul.f32 %v999_v36, %v999_v36 }
 0x52e   : > { %v1001_v37 = vmul.f32 %v1000_v25, %v999_v36 }
 0x530   : > { %v1002_v38 = vmul.f32 0.044715, %v1001_v37 }
 0x532   : > { %v1003_v39 = vadd.f32 %v1002_v38, %v999_v36 }
 0x534   : > { %v1004_v40 = vmul.f32 0.7978846, %v1003_v39 }
 0x536   : > { %1587 = vtanh.f32 %v1004_v40 }
 0x540   : > { %v1588_v41 = vpop.eup %1587 }
 0x541   : > { %v1006_v42 = vadd.f32 1.0, %v1588_v41 }
 0x543   : > { %v1007_v43 = vmul.f32 0.5, %v1006_v42 }
 0x545   : > { %v1008_v44 = vmul.f32 %v1007_v43, %v999_v36 }
 0x547   : > { %v1009_v45 = vmul.f32 0.5, %v1008_v44 }
 0x549   : > { %v1011_v46 = vrot.slane %v1009_v45, 5 }
 0x54b   : > { %v1013_v48 = vadd.f32 %v1011_v46, %v920_v61 }
 0x54d   : > { %v1018_v50 = vmul.f32 %v1017_v47, %v1013_v48 }
 0x54f   : > { %v1023_v51 = vadd.f32 %v1022_v18, %v1018_v50 }
 0x551   : > { %v1024_v52 = vpack.c.bf16 %v1023_v51, %v1023_v51 }
 0x553   : > { %v1039_v53 = vshrl.u32 %v1024_v52, 16  ;;  %v1042_v54 = vshll.u32 %v1024_v52, 16 }
 0x555   : > { %v1041_v55 = vrot.slane %v1039_v53, 1  ;;  %v1044_v56 = vrot.slane %v1042_v54, 2 }
 0x557   : > { %v1045_v57 = vor.u32 %v1044_v56, %v1041_v55 }
 0x559   : > { %1493 = vmatmul.mubr.msk.bf16.vlgmr.msra.gmra.mrb[8].mxu0 %vm355_vm1, %v1045_v57 }
 0x55a   : > { %1504 = vmatprep.mubr.msk.bf16.mxu0 %vm1656_vm0, %v1655_v1  ;;  %1497 = vmatpush3.bf16.msra.mxu0 %v1573_v15 }
 0x55b   : > { %1498 = vmatprep.subr.bf16.mxu0 %v1655_v1 }
 0x55e   : > { %1499 = vmatpush3.bf16.msra.mxu0 %v1574_v16 }
 0x55f   : > { %1500 = vmatprep.subr.bf16.mxu0 %v1655_v1 }
 0x562   : > { %1501 = vmatpush3.bf16.msra.mxu0 %v1575_v58 }
 0x563   : > { %1502 = vmatprep.subr.bf16.mxu0 %v1655_v1 }
 0x566   : > { %1503 = vmatpush3.bf16.msra.mxu0 %v1576_v59 }
 0x62c   : > { %v1095_v49 = vpop.f32.mrb[8].mxu0 }
 0x62d   : > { %v1096_v61 = vadd.f32 %v1387_v60, %v1095_v49  ;;  %v1494_v62 = vpop.f32.mrb[9].mxu0 }
 0x62e   : > { %v1098_v63 = vpop.f32.mrb[10].mxu0 }
 0x62f   : > { %v1101_v0 = vmul.f32 %v1096_v61, %v1096_v61  ;;  %v1495_v2 = vpop.f32.mrb[11].mxu0 }
 0x631   : > { %v1102_v3 = vmul.f32 %v1101_v0, %v1096_v61 }
 0x633   : > { %v1103_v4 = vmul.f32 0.044715, %v1102_v3 }
 0x635   : > { %v1104_v5 = vadd.f32 %v1103_v4, %v1096_v61 }
 0x637   : > { %v1105_v6 = vmul.f32 0.7978846, %v1104_v5 }
 0x639   : > { %1589 = vtanh.f32 %v1105_v6 }
 0x643   : > { %v1590_v7 = vpop.eup %1589 }
 0x644   : > { %v1107_v8 = vadd.f32 1.0, %v1590_v7 }
 0x646   : > { %v1108_v10 = vmul.f32 0.5, %v1107_v8 }
 0x648   : > { %v1109_v11 = vmul.f32 %v1108_v10, %v1096_v61 }
 0x64a   : > { %v1110_v12 = vpack.c.bf16 %v1109_v11, %v1109_v11 }
 0x64c   : > { %1505 = vmatmul.mubr.msk.bf16.vlgmr.msra.gmra.mrb[12].mxu0 %vm601_vm4, %v1110_v12 }
 0x71f   : > { %v1181_v14 = vpop.f32.mrb[12].mxu0 }
 0x720   : > { %v1188_v20 = vrot.slane %v1181_v14, 5  ;;  %v1506_v22 = vpop.f32.mrb[13].mxu0 }
 0x721   : > { %v1184_v23 = vpop.f32.mrb[14].mxu0 }
 0x722   : > { %v1190_v24 = vadd.f32 %v1188_v20, %v1023_v51  ;;  %v1507_v28 = vpop.f32.mrb[15].mxu0 }
 0x724   : > { %v1195_v29 = vmul.f32 %v1194_v21, %v1190_v24 }
 0x726   : > { %v1200_v30 = vadd.f32 %v1199_v26, %v1195_v29 }
 0x728   : > { %v1201_v31 = vsel %vm659_vm5, %v1200_v30, -inf }
 0x729   : > { %v1202_v1 = vrot.slane %v1201_v31, 4 }
 0x72b   : > { %v1203_v32 = vmax.f32 %v1201_v31, %v1202_v1 }
 0x72d   : > { %v1204_v33 = vrot.slane %v1203_v32, 2 }
 0x72f   : > { %v1205_v34 = vmax.f32 %v1203_v32, %v1204_v33 }
 0x731   : > { %v1206_v35 = vrot.slane %v1205_v34, 1 }
 0x733   : > { %v1207_v36 = vmax.f32 %v1205_v34, %v1206_v35 }
 0x735   : > { %v1208_v17 = vpack.c.bf16 %v1207_v36, %v1207_v36 }
 0x737   : > { %1513 = vmatmul.mubr.msk.bf16.vlgmr.msra.gmra.mrb[12].mxu1 %vm355_vm1, %v1208_v17 }
 0x80a   : > { %v1263_v27 = vpop.f32.mrb[12].mxu1 }
 0x80b   : > { %v1264_v25 = vadd.f32 %v1263_v27, %v1213_v19  ;;  %v1514_v37 = vpop.f32.mrb[13].mxu1 }
 0x80c   : > { %v1266_v38 = vpop.f32.mrb[14].mxu1 }
 0x80d   : > { %1269 = vst [vmem:[%s349_s12] sm:$0x1] %v1264_v25  ;;  %v1515_v39 = vpop.f32.mrb[15].mxu1 }
 0x80e   : > { %1604 = shalt.err (!%p1601_p3)
}
 0x80f   : > { %s1605_s28 = scalar_lea.hbm %s1990_s25, 16  ;;  %s1609_s20 = scalar_lea.hbm %s2042_s10, 32 }
 0x810   : > { %p1606_p4 = scmp.ne.s32.totalorder %s1990_s25, %s1605_s28  ;;  %p1610_p9 = scmp.lt.u32.totalorder %s1990_s25, %s2042_s10 }
 0x811   : > { %p1611_p10 = scmp.lt.u32.totalorder %s1609_s20, %s1605_s28  ;;  %p1613_p12 = scmp.lt.u32.totalorder %s1605_s28, %s1990_s25 }
 0x812   : > { %p1607_p7 = pnand %p1606_p4, %p1751_p5 }
 0x813   : > { %p1612_p11 = por %p1611_p10, %p1610_p9 }
 0x814   : > { %p1608_p8 = pneg %p1607_p7 }
 0x815   : > { %p1614_p13 = por %p1613_p12, %p1612_p11 }
 0x817   : > { %p1615_p0 = pnand %p1614_p13, %p1608_p8 }
 0x819   : > { %1618 = shalt.err (!%p1615_p0)
}
 0x81a   : > { %1516 = dma.vmem_to_hbm [thread:$0]  (%p1751_p5), %s1992_s18, 16, %s1990_s25, %s1271_s26  }
 0x81b PF: > { %p1522_p1 = scmp.ge.s32.totalorder %s1653_s16, 2  ;;  %s1295_s17 = sand.u32 1, %s1641_s13  }
 0x81c   : > { %s1296_s29 = scalar_lea.sflag [#allocation4], %s1295_s17 }
 0x81d   : > { %p1519_p2 = pnand %p1522_p1, %p1755_p6 }
 0x81f   : > { %1636 = dma.done.wait (!%p1519_p2), %s1296_s29, 16  }
 0x820   : > { %1638 = vsyncadd (!%p1519_p2), %s1296_s29, 4294967280  ;;  %p20_p3 = scmp.ge.s32.totalorder %s1738_s19, 4   ;;  %s2045_s13 = smov %s1645_s14 }
 0x821   : > { %s2046_s14 = smov %s1649_s15  ;;  %s2047_s15 = smov %s1749_s22 }
 0x822   : > { %s2048_s16 = smov %s1738_s19  ;;  %22 = sbr.rel (!%p20_p3) target bundleno = 3 (0x3), region = 105 }
 0x829   :  { %1300 = vsyncpa [#allocation4], 1 }
 0x82a   :  { %1302 = vsyncpa [#allocation4 + $0x1], 1 }

</bundles_post_ra>
